<compile_context>
chip_gen: v5e
topology: v5e:2x2
jax: 0.10.0
libtpu: 0.0.40
codegen_flags: <defaults>
</compile_context>

<pallas_src>
import jax
import jax.numpy as jnp
import numpy as np
from jax import lax
from jax.experimental import pallas as pl
from jax.experimental.pallas import tpu as pltpu

C = 128       # fixed by Conv2d(128,128,...) / BatchNorm2d(128)
QDIM = 4096   # fixed by CondBatchNorm2d(128, 4096)
EPS = 1e-5    # PyTorch BatchNorm default eps


# --------------------------------------------------------------------------
# pass 1: conv1 (1x1) + ReLU, conv2 (3x3, pad=1) as 9 accumulating MXU dots,
#          per-block mean-centered partial BN statistics.
# --------------------------------------------------------------------------
def _conv_stats_kernel(v_ref, w1_ref, b1_ref, w2_ref, b2_ref,
                       acc_ref, sum_ref, ssq_ref):
    Nb, H, W, Cc = v_ref.shape
    M = Nb * H * W

    # conv1 (1x1) == per-pixel channel matmul on the MXU, then ReLU.
    v = v_ref[...].reshape(M, Cc)                                   # bf16
    v1 = jnp.dot(v, w1_ref[...], preferred_element_type=jnp.float32)
    v1 = jnp.maximum(v1 + b1_ref[...], 0.0)                         # (M, C) f32

    # conv2 (3x3, pad=1): cast v1 to bf16 ONCE, build the zero halo ONCE, then
    # accumulate nine (M,128)x(128,128) bf16 dots (one per tap) into f32.
    v1b = v1.astype(jnp.bfloat16).reshape(Nb, H, W, Cc)
    zw = jnp.zeros((Nb, H, 1, Cc), jnp.bfloat16)
    zh = jnp.zeros((Nb, 1, W + 2, Cc), jnp.bfloat16)
    v1p = jnp.concatenate([zw, v1b, zw], axis=2)                    # pad W
    v1p = jnp.concatenate([zh, v1p, zh], axis=1)                    # pad H

    acc = jnp.zeros((M, Cc), jnp.float32)
    for ky in range(3):
        for kx in range(3):
            t = v1p[:, ky:ky + H, kx:kx + W, :].reshape(M, Cc)      # bf16 tap
            acc = acc + jnp.dot(t, w2_ref[ky * 3 + kx],
                                preferred_element_type=jnp.float32)
    acc = acc + b2_ref[...]                                         # (M, C) f32
    acc_ref[...] = acc.reshape(Nb, H, W, Cc)

    # Per-block partials, centered on the block mean (Chan combine in glue).
    s = jnp.sum(acc, axis=0, keepdims=True)                         # (1, C)
    mu = s * (1.0 / M)
    d = acc - mu
    sum_ref[...] = s.reshape(1, 1, Cc)
    ssq_ref[...] = jnp.sum(d * d, axis=0, keepdims=True).reshape(1, 1, Cc)


# --------------------------------------------------------------------------
# pass 2: folded BN/CondBN affine + ReLU + residual (v1 recomputed, no HBM
#          round-trip for v1).
# --------------------------------------------------------------------------
def _epilogue_kernel(acc_ref, v_ref, w1_ref, b1_ref, alpha_ref, beta_ref,
                     out_ref):
    Nb, H, W, Cc = out_ref.shape
    M = Nb * H * W
    v = v_ref[...].reshape(M, Cc)                                   # bf16
    v1 = jnp.dot(v, w1_ref[...], preferred_element_type=jnp.float32)
    v1 = jnp.maximum(v1 + b1_ref[...], 0.0).reshape(Nb, H, W, Cc)
    a = alpha_ref[...].reshape(Nb, 1, 1, Cc)
    b = beta_ref[...].reshape(Nb, 1, 1, Cc)
    x = acc_ref[...] * a + b
    out_ref[...] = jnp.maximum(x, 0.0) + v1


# --------------------------------------------------------------------------
# wrapper
# --------------------------------------------------------------------------
def _pick_nb(N, H, W):
    """Images per grid block: aim for M = Nb*H*W >= 512 and ~0.5+ MiB tiles,
    keep grid length >= 2 (megacore on v7x), cap per-tile f32 size at 4 MiB."""
    best = 1
    for nb in range(1, N + 1):
        if N % nb:
            continue
        if N >= 2 and N // nb < 2:
            break
        if nb * H * W * C * 4 > (4 << 20):
            break
        best = nb
        if nb * H * W >= 512:
            break
    return best


def resblock_pallas(v_nchw, q, params):
    """v_nchw: (N, 128, H, W) f32; q: (N, 4096) f32 -> (N, 128, H, W) f32."""
    (w1, b1, w2, b2, bng, bnb, wg, bg, wb, bb) = params
    N, Cc, H, W = v_nchw.shape
    assert Cc == C and q.shape[-1] == QDIM

    # Module interface is NCHW; convert once (XLA fuses transpose with the
    # bf16 cast).  TODO(synk): keep surrounding model NHWC to drop this pass.
    v_nhwc = jnp.transpose(v_nchw, (0, 2, 3, 1)).astype(jnp.bfloat16)
    w1_bf = w1.astype(jnp.bfloat16)                      # (C, C)
    w2_bf = w2.astype(jnp.bfloat16)                      # (9, C, C) tap-major

    # CondBN conditioning Linear(4096 -> 128) hoisted out of the kernels.
    gam = q @ wg + bg                                    # (N, C)
    bet = q @ wb + bb                                    # (N, C)

    Nb = _pick_nb(N, H, W)
    G = N // Nb
    Mb = Nb * H * W
    Mtot = N * H * W

    img_spec = pl.BlockSpec((Nb, H, W, Cc), lambda n: (n, 0, 0, 0))
    stat_spec = pl.BlockSpec((1, 1, Cc), lambda n: (n, 0, 0))
    vec_spec = pl.BlockSpec((1, Cc), lambda n: (0, 0))
    cparams = pltpu.CompilerParams(
        dimension_semantics=("parallel",),               # batch blocks -> TCs
        vmem_limit_bytes=32 * 1024 * 1024,
    )

    # ---- pass 1: convs + per-block centered partial BN stats ---------------
    acc, psum, pssq = pl.pallas_call(
        _conv_stats_kernel,
        grid=(G,),
        in_specs=[img_spec,
                  pl.BlockSpec((Cc, Cc), lambda n: (0, 0)),
                  vec_spec,
                  pl.BlockSpec((9, Cc, Cc), lambda n: (0, 0, 0)),
                  vec_spec],
        out_specs=[img_spec, stat_spec, stat_spec],
        out_shape=[jax.ShapeDtypeStruct((N, H, W, Cc), jnp.float32),
                   jax.ShapeDtypeStruct((G, 1, Cc), jnp.float32),
                   jax.ShapeDtypeStruct((G, 1, Cc), jnp.float32)],
        compiler_params=cparams,
    )(v_nhwc, w1_bf, b1, w2_bf, b2)

    # ---- tiny XLA glue: Chan combine of block stats + analytic BN fold -----
    bsum = psum.reshape(G, Cc)
    bssq = pssq.reshape(G, Cc)
    mean = jnp.sum(bsum, axis=0) / Mtot                              # (C,)
    mu_b = bsum / Mb
    var = (jnp.sum(bssq, axis=0)
           + Mb * jnp.sum((mu_b - mean[None, :]) ** 2, axis=0)) / Mtot
    var = jnp.maximum(var, 0.0)
    rs1 = lax.rsqrt(var + EPS)
    g = bng.reshape(Cc)
    # Inner (affine-free, batch-stat) BN of CondBN folded exactly:
    #   mean2 == bnb (cancels), var2 == g^2 * var / (var + eps)
    s = rs1 * g * lax.rsqrt(g * g * var * rs1 * rs1 + EPS)           # (C,)
    alpha2d = gam * s[None, :]                                       # (N, C)
    beta2d = bet - mean[None, :] * alpha2d
    alpha = alpha2d.reshape(N, 1, Cc)
    beta = beta2d.reshape(N, 1, Cc)

    # ---- pass 2: per-pixel affine + ReLU + residual -------------------------
    out_nhwc = pl.pallas_call(
        _epilogue_kernel,
        grid=(G,),
        in_specs=[img_spec, img_spec,
                  pl.BlockSpec((Cc, Cc), lambda n: (0, 0)),
                  vec_spec,
                  pl.BlockSpec((Nb, 1, Cc), lambda n: (n, 0, 0)),
                  pl.BlockSpec((Nb, 1, Cc), lambda n: (n, 0, 0))],
        out_specs=img_spec,
        out_shape=jax.ShapeDtypeStruct((N, H, W, Cc), jnp.float32),
        compiler_params=cparams,
    )(acc, v_nhwc, w1_bf, b1, alpha, beta)

    return jnp.transpose(out_nhwc, (0, 3, 1, 2))                     # -> NCHW


# --------------------------------------------------------------------------
# pure-JAX f32 reference (original un-folded math) for verification
# --------------------------------------------------------------------------
def resblock_ref(v_nchw, q, params):
    (w1, b1, w2, b2, bng, bnb, wg, bg, wb, bb) = params
    N, Cc, H, W = v_nchw.shape
    v = jnp.transpose(v_nchw, (0, 2, 3, 1)).reshape(-1, Cc)
    v1 = jnp.maximum(v @ w1 + b1, 0.0)
    v1_img = v1.reshape(N, H, W, Cc)
    padded = jnp.pad(v1_img, ((0, 0), (1, 1), (1, 1), (0, 0)))
    acc = jnp.zeros((N * H * W, Cc), jnp.float32) + b2
    for ky in range(3):
        for kx in range(3):
            acc = acc + padded[:, ky:ky + H, kx:kx + W, :].reshape(-1, Cc) @ w2[ky * 3 + kx]
    mean = acc.mean(0, keepdims=True)
    var = ((acc - mean) ** 2).mean(0, keepdims=True)
    vbn = (acc - mean) / jnp.sqrt(var + EPS) * bng + bnb
    gam = q @ wg + bg
    bet = q @ wb + bb
    mean2 = vbn.mean(0, keepdims=True)
    var2 = ((vbn - mean2) ** 2).mean(0, keepdims=True)
    xhat2 = ((vbn - mean2) / jnp.sqrt(var2 + EPS)).reshape(N, H, W, Cc)
    vc = xhat2 * gam[:, None, None, :] + bet[:, None, None, :]
    out = jnp.maximum(vc, 0.0) + v1_img
    return jnp.transpose(out, (0, 3, 1, 2))


def init_params(key):
    ks = jax.random.split(key, 10)
    w1 = jax.random.normal(ks[0], (C, C), jnp.float32) / np.sqrt(C)          # conv1 1x1: (Cin, Cout)
    b1 = 0.01 * jax.random.normal(ks[1], (1, C), jnp.float32)
    w2 = jax.random.normal(ks[2], (9, C, C), jnp.float32) / np.sqrt(9 * C)   # conv2 taps: (ky*3+kx, Cin, Cout)
    b2 = 0.01 * jax.random.normal(ks[3], (1, C), jnp.float32)
    bng = 1.0 + 0.1 * jax.random.normal(ks[4], (1, C), jnp.float32)          # BN gamma
    bnb = 0.1 * jax.random.normal(ks[5], (1, C), jnp.float32)                # BN beta
    wg = jax.random.normal(ks[6], (QDIM, C), jnp.float32) / np.sqrt(QDIM)    # CondBN gamma Linear
    bg = 1.0 + 0.01 * jax.random.normal(ks[7], (1, C), jnp.float32)
    wb = jax.random.normal(ks[8], (QDIM, C), jnp.float32) / np.sqrt(QDIM)    # CondBN beta Linear
    bb = 0.01 * jax.random.normal(ks[9], (1, C), jnp.float32)
    return (w1, b1, w2, b2, bng, bnb, wg, bg, wb, bb)


if __name__ == "__main__":
    key = jax.random.PRNGKey(0)
    k_v, k_q, k_p = jax.random.split(key, 3)

    N, H, W = 2, 8, 8
    v = jax.random.normal(k_v, (N, C, H, W), jnp.float32)   # PyTorch NCHW input
    q = jax.random.normal(k_q, (N, QDIM), jnp.float32)      # conditioning vector
    params = init_params(k_p)

    out = jax.block_until_ready(jax.jit(resblock_pallas)(v, q, params))
    ref = jax.block_until_ready(resblock_ref(v, q, params))

    # Tolerance sized for bf16 MXU inputs (f32 accumulation) vs the f32 reference.
    np.testing.assert_allclose(np.asarray(out), np.asarray(ref), rtol=3e-2, atol=5e-2)
    assert out.shape == (N, C, H, W) and out.dtype == jnp.float32
    print("KERNEL_OK")
</pallas_src>

<mosaic_0001>
module attributes {stable_mosaic.version = 11 : i64} {
  func.func @_conv_stats_kernel(%arg0: i32, %arg1: memref<1x8x8x128xbf16, #tpu.memory_space<vmem>>, %arg2: memref<128x128xbf16, #tpu.memory_space<vmem>>, %arg3: memref<1x128xf32, #tpu.memory_space<vmem>>, %arg4: memref<9x128x128xbf16, #tpu.memory_space<vmem>>, %arg5: memref<1x128xf32, #tpu.memory_space<vmem>>, %arg6: memref<1x8x8x128xf32, #tpu.memory_space<vmem>>, %arg7: memref<1x1x128xf32, #tpu.memory_space<vmem>>, %arg8: memref<1x1x128xf32, #tpu.memory_space<vmem>>) attributes {dimension_semantics = [#tpu.dimension_semantics<parallel>], iteration_bounds = array<i64: 2>, scalar_prefetch = 0 : i64, scratch_operands = 0 : i64, tpu.core_type = #tpu.core_type<tc>, window_params = [{transform_indices = @transform_0, window_bounds = array<i64: 1, 8, 8, 128>}, {pipeline_mode = #tpu.pipeline_mode<synchronous>, transform_indices = @transform_1, window_bounds = array<i64: 128, 128>}, {pipeline_mode = #tpu.pipeline_mode<synchronous>, transform_indices = @transform_2, window_bounds = array<i64: 1, 128>}, {pipeline_mode = #tpu.pipeline_mode<synchronous>, transform_indices = @transform_3, window_bounds = array<i64: 9, 128, 128>}, {pipeline_mode = #tpu.pipeline_mode<synchronous>, transform_indices = @transform_4, window_bounds = array<i64: 1, 128>}, {transform_indices = @transform_5, window_bounds = array<i64: 1, 8, 8, 128>}, {transform_indices = @transform_6, window_bounds = array<i64: 1, 1, 128>}, {transform_indices = @transform_7, window_bounds = array<i64: 1, 1, 128>}]} {
    %c0 = arith.constant 0 : index
    %c0_0 = arith.constant 0 : index
    %c0_1 = arith.constant 0 : index
    %c0_2 = arith.constant 0 : index
    %0 = vector.load %arg1[%c0, %c0_0, %c0_1, %c0_2] : memref<1x8x8x128xbf16, #tpu.memory_space<vmem>>, vector<1x8x8x128xbf16>
    %1 = vector.shape_cast %0 : vector<1x8x8x128xbf16> to vector<64x128xbf16>
    %c0_3 = arith.constant 0 : index
    %c0_4 = arith.constant 0 : index
    %2 = vector.load %arg2[%c0_3, %c0_4] : memref<128x128xbf16, #tpu.memory_space<vmem>>, vector<128x128xbf16>
    %cst = arith.constant dense<0.000000e+00> : vector<64x128xf32>
    %3 = tpu.matmul %1, %2, %cst {dimension_numbers = #tpu.dot_dimension_numbers<[1], [0], [0], [1], [0, 0, 1, 1], [], []>} : vector<64x128xbf16>, vector<128x128xbf16>, vector<64x128xf32> -> vector<64x128xf32>
    %c0_5 = arith.constant 0 : index
    %c0_6 = arith.constant 0 : index
    %4 = vector.load %arg3[%c0_5, %c0_6] : memref<1x128xf32, #tpu.memory_space<vmem>>, vector<1x128xf32>
    %5 = vector.broadcast %4 : vector<1x128xf32> to vector<64x128xf32>
    %6 = arith.addf %3, %5 : vector<64x128xf32>
    %cst_7 = arith.constant 0.000000e+00 : f32
    %7 = vector.broadcast %cst_7 : f32 to vector<64x128xf32>
    %8 = arith.maximumf %6, %7 : vector<64x128xf32>
    %9 = arith.truncf %8 : vector<64x128xf32> to vector<64x128xbf16>
    %10 = vector.shape_cast %9 : vector<64x128xbf16> to vector<1x8x8x128xbf16>
    %cst_8 = arith.constant 0.000000e+00 : bf16
    %11 = vector.broadcast %cst_8 : bf16 to vector<1x8x1x128xbf16>
    %cst_9 = arith.constant 0.000000e+00 : bf16
    %12 = vector.broadcast %cst_9 : bf16 to vector<1x1x10x128xbf16>
    %13 = tpu.concatenate %11, %10, %11 in 2 : vector<1x8x1x128xbf16>, vector<1x8x8x128xbf16>, vector<1x8x1x128xbf16> -> vector<1x8x10x128xbf16>
    %14 = tpu.concatenate %12, %13, %12 in 1 : vector<1x1x10x128xbf16>, vector<1x8x10x128xbf16>, vector<1x1x10x128xbf16> -> vector<1x10x10x128xbf16>
    %cst_10 = arith.constant 0.000000e+00 : f32
    %15 = vector.broadcast %cst_10 : f32 to vector<64x128xf32>
    %16 = vector.extract_strided_slice %14 {offsets = [0, 0, 0, 0], sizes = [1, 8, 8, 128], strides = [1, 1, 1, 1]} : vector<1x10x10x128xbf16> to vector<1x8x8x128xbf16>
    %17 = vector.shape_cast %16 : vector<1x8x8x128xbf16> to vector<64x128xbf16>
    %c0_11 = arith.constant 0 : index
    %c0_12 = arith.constant 0 : index
    %c0_13 = arith.constant 0 : index
    %18 = vector.load %arg4[%c0_11, %c0_12, %c0_13] : memref<9x128x128xbf16, #tpu.memory_space<vmem>>, vector<1x128x128xbf16>
    %19 = vector.shape_cast %18 : vector<1x128x128xbf16> to vector<128x128xbf16>
    %cst_14 = arith.constant dense<0.000000e+00> : vector<64x128xf32>
    %20 = tpu.matmul %17, %19, %cst_14 {dimension_numbers = #tpu.dot_dimension_numbers<[1], [0], [0], [1], [0, 0, 1, 1], [], []>} : vector<64x128xbf16>, vector<128x128xbf16>, vector<64x128xf32> -> vector<64x128xf32>
    %21 = arith.addf %15, %20 : vector<64x128xf32>
    %22 = vector.extract_strided_slice %14 {offsets = [0, 0, 1, 0], sizes = [1, 8, 8, 128], strides = [1, 1, 1, 1]} : vector<1x10x10x128xbf16> to vector<1x8x8x128xbf16>
    %23 = vector.shape_cast %22 : vector<1x8x8x128xbf16> to vector<64x128xbf16>
    %c1 = arith.constant 1 : index
    %c0_15 = arith.constant 0 : index
    %c0_16 = arith.constant 0 : index
    %24 = vector.load %arg4[%c1, %c0_15, %c0_16] : memref<9x128x128xbf16, #tpu.memory_space<vmem>>, vector<1x128x128xbf16>
    %25 = vector.shape_cast %24 : vector<1x128x128xbf16> to vector<128x128xbf16>
    %cst_17 = arith.constant dense<0.000000e+00> : vector<64x128xf32>
    %26 = tpu.matmul %23, %25, %cst_17 {dimension_numbers = #tpu.dot_dimension_numbers<[1], [0], [0], [1], [0, 0, 1, 1], [], []>} : vector<64x128xbf16>, vector<128x128xbf16>, vector<64x128xf32> -> vector<64x128xf32>
    %27 = arith.addf %21, %26 : vector<64x128xf32>
    %28 = vector.extract_strided_slice %14 {offsets = [0, 0, 2, 0], sizes = [1, 8, 8, 128], strides = [1, 1, 1, 1]} : vector<1x10x10x128xbf16> to vector<1x8x8x128xbf16>
    %29 = vector.shape_cast %28 : vector<1x8x8x128xbf16> to vector<64x128xbf16>
    %c2 = arith.constant 2 : index
    %c0_18 = arith.constant 0 : index
    %c0_19 = arith.constant 0 : index
    %30 = vector.load %arg4[%c2, %c0_18, %c0_19] : memref<9x128x128xbf16, #tpu.memory_space<vmem>>, vector<1x128x128xbf16>
    %31 = vector.shape_cast %30 : vector<1x128x128xbf16> to vector<128x128xbf16>
    %cst_20 = arith.constant dense<0.000000e+00> : vector<64x128xf32>
    %32 = tpu.matmul %29, %31, %cst_20 {dimension_numbers = #tpu.dot_dimension_numbers<[1], [0], [0], [1], [0, 0, 1, 1], [], []>} : vector<64x128xbf16>, vector<128x128xbf16>, vector<64x128xf32> -> vector<64x128xf32>
    %33 = arith.addf %27, %32 : vector<64x128xf32>
    %34 = vector.extract_strided_slice %14 {offsets = [0, 1, 0, 0], sizes = [1, 8, 8, 128], strides = [1, 1, 1, 1]} : vector<1x10x10x128xbf16> to vector<1x8x8x128xbf16>
    %35 = vector.shape_cast %34 : vector<1x8x8x128xbf16> to vector<64x128xbf16>
    %c3 = arith.constant 3 : index
    %c0_21 = arith.constant 0 : index
    %c0_22 = arith.constant 0 : index
    %36 = vector.load %arg4[%c3, %c0_21, %c0_22] : memref<9x128x128xbf16, #tpu.memory_space<vmem>>, vector<1x128x128xbf16>
    %37 = vector.shape_cast %36 : vector<1x128x128xbf16> to vector<128x128xbf16>
    %cst_23 = arith.constant dense<0.000000e+00> : vector<64x128xf32>
    %38 = tpu.matmul %35, %37, %cst_23 {dimension_numbers = #tpu.dot_dimension_numbers<[1], [0], [0], [1], [0, 0, 1, 1], [], []>} : vector<64x128xbf16>, vector<128x128xbf16>, vector<64x128xf32> -> vector<64x128xf32>
    %39 = arith.addf %33, %38 : vector<64x128xf32>
    %40 = vector.extract_strided_slice %14 {offsets = [0, 1, 1, 0], sizes = [1, 8, 8, 128], strides = [1, 1, 1, 1]} : vector<1x10x10x128xbf16> to vector<1x8x8x128xbf16>
    %41 = vector.shape_cast %40 : vector<1x8x8x128xbf16> to vector<64x128xbf16>
    %c4 = arith.constant 4 : index
    %c0_24 = arith.constant 0 : index
    %c0_25 = arith.constant 0 : index
    %42 = vector.load %arg4[%c4, %c0_24, %c0_25] : memref<9x128x128xbf16, #tpu.memory_space<vmem>>, vector<1x128x128xbf16>
    %43 = vector.shape_cast %42 : vector<1x128x128xbf16> to vector<128x128xbf16>
    %cst_26 = arith.constant dense<0.000000e+00> : vector<64x128xf32>
    %44 = tpu.matmul %41, %43, %cst_26 {dimension_numbers = #tpu.dot_dimension_numbers<[1], [0], [0], [1], [0, 0, 1, 1], [], []>} : vector<64x128xbf16>, vector<128x128xbf16>, vector<64x128xf32> -> vector<64x128xf32>
    %45 = arith.addf %39, %44 : vector<64x128xf32>
    %46 = vector.extract_strided_slice %14 {offsets = [0, 1, 2, 0], sizes = [1, 8, 8, 128], strides = [1, 1, 1, 1]} : vector<1x10x10x128xbf16> to vector<1x8x8x128xbf16>
    %47 = vector.shape_cast %46 : vector<1x8x8x128xbf16> to vector<64x128xbf16>
    %c5 = arith.constant 5 : index
    %c0_27 = arith.constant 0 : index
    %c0_28 = arith.constant 0 : index
    %48 = vector.load %arg4[%c5, %c0_27, %c0_28] : memref<9x128x128xbf16, #tpu.memory_space<vmem>>, vector<1x128x128xbf16>
    %49 = vector.shape_cast %48 : vector<1x128x128xbf16> to vector<128x128xbf16>
    %cst_29 = arith.constant dense<0.000000e+00> : vector<64x128xf32>
    %50 = tpu.matmul %47, %49, %cst_29 {dimension_numbers = #tpu.dot_dimension_numbers<[1], [0], [0], [1], [0, 0, 1, 1], [], []>} : vector<64x128xbf16>, vector<128x128xbf16>, vector<64x128xf32> -> vector<64x128xf32>
    %51 = arith.addf %45, %50 : vector<64x128xf32>
    %52 = vector.extract_strided_slice %14 {offsets = [0, 2, 0, 0], sizes = [1, 8, 8, 128], strides = [1, 1, 1, 1]} : vector<1x10x10x128xbf16> to vector<1x8x8x128xbf16>
    %53 = vector.shape_cast %52 : vector<1x8x8x128xbf16> to vector<64x128xbf16>
    %c6 = arith.constant 6 : index
    %c0_30 = arith.constant 0 : index
    %c0_31 = arith.constant 0 : index
    %54 = vector.load %arg4[%c6, %c0_30, %c0_31] : memref<9x128x128xbf16, #tpu.memory_space<vmem>>, vector<1x128x128xbf16>
    %55 = vector.shape_cast %54 : vector<1x128x128xbf16> to vector<128x128xbf16>
    %cst_32 = arith.constant dense<0.000000e+00> : vector<64x128xf32>
    %56 = tpu.matmul %53, %55, %cst_32 {dimension_numbers = #tpu.dot_dimension_numbers<[1], [0], [0], [1], [0, 0, 1, 1], [], []>} : vector<64x128xbf16>, vector<128x128xbf16>, vector<64x128xf32> -> vector<64x128xf32>
    %57 = arith.addf %51, %56 : vector<64x128xf32>
    %58 = vector.extract_strided_slice %14 {offsets = [0, 2, 1, 0], sizes = [1, 8, 8, 128], strides = [1, 1, 1, 1]} : vector<1x10x10x128xbf16> to vector<1x8x8x128xbf16>
    %59 = vector.shape_cast %58 : vector<1x8x8x128xbf16> to vector<64x128xbf16>
    %c7 = arith.constant 7 : index
    %c0_33 = arith.constant 0 : index
    %c0_34 = arith.constant 0 : index
    %60 = vector.load %arg4[%c7, %c0_33, %c0_34] : memref<9x128x128xbf16, #tpu.memory_space<vmem>>, vector<1x128x128xbf16>
    %61 = vector.shape_cast %60 : vector<1x128x128xbf16> to vector<128x128xbf16>
    %cst_35 = arith.constant dense<0.000000e+00> : vector<64x128xf32>
    %62 = tpu.matmul %59, %61, %cst_35 {dimension_numbers = #tpu.dot_dimension_numbers<[1], [0], [0], [1], [0, 0, 1, 1], [], []>} : vector<64x128xbf16>, vector<128x128xbf16>, vector<64x128xf32> -> vector<64x128xf32>
    %63 = arith.addf %57, %62 : vector<64x128xf32>
    %64 = vector.extract_strided_slice %14 {offsets = [0, 2, 2, 0], sizes = [1, 8, 8, 128], strides = [1, 1, 1, 1]} : vector<1x10x10x128xbf16> to vector<1x8x8x128xbf16>
    %65 = vector.shape_cast %64 : vector<1x8x8x128xbf16> to vector<64x128xbf16>
    %c8 = arith.constant 8 : index
    %c0_36 = arith.constant 0 : index
    %c0_37 = arith.constant 0 : index
    %66 = vector.load %arg4[%c8, %c0_36, %c0_37] : memref<9x128x128xbf16, #tpu.memory_space<vmem>>, vector<1x128x128xbf16>
    %67 = vector.shape_cast %66 : vector<1x128x128xbf16> to vector<128x128xbf16>
    %cst_38 = arith.constant dense<0.000000e+00> : vector<64x128xf32>
    %68 = tpu.matmul %65, %67, %cst_38 {dimension_numbers = #tpu.dot_dimension_numbers<[1], [0], [0], [1], [0, 0, 1, 1], [], []>} : vector<64x128xbf16>, vector<128x128xbf16>, vector<64x128xf32> -> vector<64x128xf32>
    %69 = arith.addf %63, %68 : vector<64x128xf32>
    %c0_39 = arith.constant 0 : index
    %c0_40 = arith.constant 0 : index
    %70 = vector.load %arg5[%c0_39, %c0_40] : memref<1x128xf32, #tpu.memory_space<vmem>>, vector<1x128xf32>
    %71 = vector.broadcast %70 : vector<1x128xf32> to vector<64x128xf32>
    %72 = arith.addf %69, %71 : vector<64x128xf32>
    %73 = vector.shape_cast %72 : vector<64x128xf32> to vector<1x8x8x128xf32>
    %c0_41 = arith.constant 0 : index
    %c0_42 = arith.constant 0 : index
    %c0_43 = arith.constant 0 : index
    %c0_44 = arith.constant 0 : index
    %74 = vector.load %arg6[%c0_41, %c0_42, %c0_43, %c0_44] : memref<1x8x8x128xf32, #tpu.memory_space<vmem>>, vector<1x8x8x128xf32>
    tpu.vector_store %arg6[%c0_41, %c0_42, %c0_43, %c0_44], %73 {strides = array<i32>} : memref<1x8x8x128xf32, #tpu.memory_space<vmem>>, vector<1x8x8x128xf32>,
    %cst_45 = arith.constant dense<0.000000e+00> : vector<128xf32>
    %75 = vector.multi_reduction <add>, %72, %cst_45 [0] : vector<64x128xf32> to vector<128xf32>
    %76 = vector.shape_cast %75 : vector<128xf32> to vector<1x128xf32>
    %cst_46 = arith.constant 1.562500e-02 : f32
    %77 = vector.broadcast %cst_46 : f32 to vector<1x128xf32>
    %78 = arith.mulf %76, %77 : vector<1x128xf32>
    %79 = vector.broadcast %78 : vector<1x128xf32> to vector<64x128xf32>
    %80 = arith.subf %72, %79 : vector<64x128xf32>
    %81 = vector.shape_cast %76 : vector<1x128xf32> to vector<1x1x128xf32>
    %c0_47 = arith.constant 0 : index
    %c0_48 = arith.constant 0 : index
    %c0_49 = arith.constant 0 : index
    %82 = vector.load %arg7[%c0_47, %c0_48, %c0_49] : memref<1x1x128xf32, #tpu.memory_space<vmem>>, vector<1x1x128xf32>
    tpu.vector_store %arg7[%c0_47, %c0_48, %c0_49], %81 {strides = array<i32>} : memref<1x1x128xf32, #tpu.memory_space<vmem>>, vector<1x1x128xf32>,
    %83 = arith.mulf %80, %80 : vector<64x128xf32>
    %cst_50 = arith.constant dense<0.000000e+00> : vector<128xf32>
    %84 = vector.multi_reduction <add>, %83, %cst_50 [0] : vector<64x128xf32> to vector<128xf32>
    %85 = vector.shape_cast %84 : vector<128xf32> to vector<1x128xf32>
    %86 = vector.shape_cast %85 : vector<1x128xf32> to vector<1x1x128xf32>
    %c0_51 = arith.constant 0 : index
    %c0_52 = arith.constant 0 : index
    %c0_53 = arith.constant 0 : index
    %87 = vector.load %arg8[%c0_51, %c0_52, %c0_53] : memref<1x1x128xf32, #tpu.memory_space<vmem>>, vector<1x1x128xf32>
    tpu.vector_store %arg8[%c0_51, %c0_52, %c0_53], %86 {strides = array<i32>} : memref<1x1x128xf32, #tpu.memory_space<vmem>>, vector<1x1x128xf32>,
    return
  }
  func.func @transform_0(%arg0: i32) -> (i32, i32, i32, i32) {
    %c0_i32 = arith.constant 0 : i32
    %c0_i32_0 = arith.constant 0 : i32
    %c0_i32_1 = arith.constant 0 : i32
    %c0_i32_2 = arith.constant 0 : i32
    return %arg0, %c0_i32, %c0_i32_0, %c0_i32_1 : i32, i32, i32, i32
  }
  func.func @transform_1(%arg0: i32) -> (i32, i32) {
    %c0_i32 = arith.constant 0 : i32
    %c0_i32_0 = arith.constant 0 : i32
    %c0_i32_1 = arith.constant 0 : i32
    return %c0_i32, %c0_i32_0 : i32, i32
  }
  func.func @transform_2(%arg0: i32) -> (i32, i32) {
    %c0_i32 = arith.constant 0 : i32
    %c0_i32_0 = arith.constant 0 : i32
    %c0_i32_1 = arith.constant 0 : i32
    return %c0_i32, %c0_i32_0 : i32, i32
  }
  func.func @transform_3(%arg0: i32) -> (i32, i32, i32) {
    %c0_i32 = arith.constant 0 : i32
    %c0_i32_0 = arith.constant 0 : i32
    %c0_i32_1 = arith.constant 0 : i32
    %c0_i32_2 = arith.constant 0 : i32
    return %c0_i32, %c0_i32_0, %c0_i32_1 : i32, i32, i32
  }
  func.func @transform_4(%arg0: i32) -> (i32, i32) {
    %c0_i32 = arith.constant 0 : i32
    %c0_i32_0 = arith.constant 0 : i32
    %c0_i32_1 = arith.constant 0 : i32
    return %c0_i32, %c0_i32_0 : i32, i32
  }
  func.func @transform_5(%arg0: i32) -> (i32, i32, i32, i32) {
    %c0_i32 = arith.constant 0 : i32
    %c0_i32_0 = arith.constant 0 : i32
    %c0_i32_1 = arith.constant 0 : i32
    %c0_i32_2 = arith.constant 0 : i32
    return %arg0, %c0_i32, %c0_i32_0, %c0_i32_1 : i32, i32, i32, i32
  }
  func.func @transform_6(%arg0: i32) -> (i32, i32, i32) {
    %c0_i32 = arith.constant 0 : i32
    %c0_i32_0 = arith.constant 0 : i32
    %c0_i32_1 = arith.constant 0 : i32
    return %arg0, %c0_i32, %c0_i32_0 : i32, i32, i32
  }
  func.func @transform_7(%arg0: i32) -> (i32, i32, i32) {
    %c0_i32 = arith.constant 0 : i32
    %c0_i32_0 = arith.constant 0 : i32
    %c0_i32_1 = arith.constant 0 : i32
    return %arg0, %c0_i32, %c0_i32_0 : i32, i32, i32
  }
}

module attributes {stable_mosaic.version = 11 : i64} {
  func.func @_epilogue_kernel(%arg0: i32, %arg1: memref<1x8x8x128xf32, #tpu.memory_space<vmem>>, %arg2: memref<1x8x8x128xbf16, #tpu.memory_space<vmem>>, %arg3: memref<128x128xbf16, #tpu.memory_space<vmem>>, %arg4: memref<1x128xf32, #tpu.memory_space<vmem>>, %arg5: memref<1x1x128xf32, #tpu.memory_space<vmem>>, %arg6: memref<1x1x128xf32, #tpu.memory_space<vmem>>, %arg7: memref<1x8x8x128xf32, #tpu.memory_space<vmem>>) attributes {dimension_semantics = [#tpu.dimension_semantics<parallel>], iteration_bounds = array<i64: 2>, scalar_prefetch = 0 : i64, scratch_operands = 0 : i64, tpu.core_type = #tpu.core_type<tc>, window_params = [{transform_indices = @transform_0, window_bounds = array<i64: 1, 8, 8, 128>}, {transform_indices = @transform_1, window_bounds = array<i64: 1, 8, 8, 128>}, {pipeline_mode = #tpu.pipeline_mode<synchronous>, transform_indices = @transform_2, window_bounds = array<i64: 128, 128>}, {pipeline_mode = #tpu.pipeline_mode<synchronous>, transform_indices = @transform_3, window_bounds = array<i64: 1, 128>}, {transform_indices = @transform_4, window_bounds = array<i64: 1, 1, 128>}, {transform_indices = @transform_5, window_bounds = array<i64: 1, 1, 128>}, {transform_indices = @transform_6, window_bounds = array<i64: 1, 8, 8, 128>}]} {
    %c0 = arith.constant 0 : index
    %c0_0 = arith.constant 0 : index
    %c0_1 = arith.constant 0 : index
    %c0_2 = arith.constant 0 : index
    %0 = vector.load %arg2[%c0, %c0_0, %c0_1, %c0_2] : memref<1x8x8x128xbf16, #tpu.memory_space<vmem>>, vector<1x8x8x128xbf16>
    %1 = vector.shape_cast %0 : vector<1x8x8x128xbf16> to vector<64x128xbf16>
    %c0_3 = arith.constant 0 : index
    %c0_4 = arith.constant 0 : index
    %2 = vector.load %arg3[%c0_3, %c0_4] : memref<128x128xbf16, #tpu.memory_space<vmem>>, vector<128x128xbf16>
    %cst = arith.constant dense<0.000000e+00> : vector<64x128xf32>
    %3 = tpu.matmul %1, %2, %cst {dimension_numbers = #tpu.dot_dimension_numbers<[1], [0], [0], [1], [0, 0, 1, 1], [], []>} : vector<64x128xbf16>, vector<128x128xbf16>, vector<64x128xf32> -> vector<64x128xf32>
    %c0_5 = arith.constant 0 : index
    %c0_6 = arith.constant 0 : index
    %4 = vector.load %arg4[%c0_5, %c0_6] : memref<1x128xf32, #tpu.memory_space<vmem>>, vector<1x128xf32>
    %5 = vector.broadcast %4 : vector<1x128xf32> to vector<64x128xf32>
    %6 = arith.addf %3, %5 : vector<64x128xf32>
    %cst_7 = arith.constant 0.000000e+00 : f32
    %7 = vector.broadcast %cst_7 : f32 to vector<64x128xf32>
    %8 = arith.maximumf %6, %7 : vector<64x128xf32>
    %9 = vector.shape_cast %8 : vector<64x128xf32> to vector<1x8x8x128xf32>
    %c0_8 = arith.constant 0 : index
    %c0_9 = arith.constant 0 : index
    %c0_10 = arith.constant 0 : index
    %10 = vector.load %arg5[%c0_8, %c0_9, %c0_10] : memref<1x1x128xf32, #tpu.memory_space<vmem>>, vector<1x1x128xf32>
    %11 = vector.shape_cast %10 : vector<1x1x128xf32> to vector<1x1x1x128xf32>
    %c0_11 = arith.constant 0 : index
    %c0_12 = arith.constant 0 : index
    %c0_13 = arith.constant 0 : index
    %12 = vector.load %arg6[%c0_11, %c0_12, %c0_13] : memref<1x1x128xf32, #tpu.memory_space<vmem>>, vector<1x1x128xf32>
    %13 = vector.shape_cast %12 : vector<1x1x128xf32> to vector<1x1x1x128xf32>
    %c0_14 = arith.constant 0 : index
    %c0_15 = arith.constant 0 : index
    %c0_16 = arith.constant 0 : index
    %c0_17 = arith.constant 0 : index
    %14 = vector.load %arg1[%c0_14, %c0_15, %c0_16, %c0_17] : memref<1x8x8x128xf32, #tpu.memory_space<vmem>>, vector<1x8x8x128xf32>
    %15 = vector.broadcast %11 : vector<1x1x1x128xf32> to vector<1x8x8x128xf32>
    %16 = arith.mulf %14, %15 : vector<1x8x8x128xf32>
    %17 = vector.broadcast %13 : vector<1x1x1x128xf32> to vector<1x8x8x128xf32>
    %18 = arith.addf %16, %17 : vector<1x8x8x128xf32>
    %cst_18 = arith.constant 0.000000e+00 : f32
    %19 = vector.broadcast %cst_18 : f32 to vector<1x8x8x128xf32>
    %20 = arith.maximumf %18, %19 : vector<1x8x8x128xf32>
    %21 = arith.addf %20, %9 : vector<1x8x8x128xf32>
    %c0_19 = arith.constant 0 : index
    %c0_20 = arith.constant 0 : index
    %c0_21 = arith.constant 0 : index
    %c0_22 = arith.constant 0 : index
    %22 = vector.load %arg7[%c0_19, %c0_20, %c0_21, %c0_22] : memref<1x8x8x128xf32, #tpu.memory_space<vmem>>, vector<1x8x8x128xf32>
    tpu.vector_store %arg7[%c0_19, %c0_20, %c0_21, %c0_22], %21 {strides = array<i32>} : memref<1x8x8x128xf32, #tpu.memory_space<vmem>>, vector<1x8x8x128xf32>,
    return
  }
  func.func @transform_0(%arg0: i32) -> (i32, i32, i32, i32) {
    %c0_i32 = arith.constant 0 : i32
    %c0_i32_0 = arith.constant 0 : i32
    %c0_i32_1 = arith.constant 0 : i32
    %c0_i32_2 = arith.constant 0 : i32
    return %arg0, %c0_i32, %c0_i32_0, %c0_i32_1 : i32, i32, i32, i32
  }
  func.func @transform_1(%arg0: i32) -> (i32, i32, i32, i32) {
    %c0_i32 = arith.constant 0 : i32
    %c0_i32_0 = arith.constant 0 : i32
    %c0_i32_1 = arith.constant 0 : i32
    %c0_i32_2 = arith.constant 0 : i32
    return %arg0, %c0_i32, %c0_i32_0, %c0_i32_1 : i32, i32, i32, i32
  }
  func.func @transform_2(%arg0: i32) -> (i32, i32) {
    %c0_i32 = arith.constant 0 : i32
    %c0_i32_0 = arith.constant 0 : i32
    %c0_i32_1 = arith.constant 0 : i32
    return %c0_i32, %c0_i32_0 : i32, i32
  }
  func.func @transform_3(%arg0: i32) -> (i32, i32) {
    %c0_i32 = arith.constant 0 : i32
    %c0_i32_0 = arith.constant 0 : i32
    %c0_i32_1 = arith.constant 0 : i32
    return %c0_i32, %c0_i32_0 : i32, i32
  }
  func.func @transform_4(%arg0: i32) -> (i32, i32, i32) {
    %c0_i32 = arith.constant 0 : i32
    %c0_i32_0 = arith.constant 0 : i32
    %c0_i32_1 = arith.constant 0 : i32
    return %arg0, %c0_i32, %c0_i32_0 : i32, i32, i32
  }
  func.func @transform_5(%arg0: i32) -> (i32, i32, i32) {
    %c0_i32 = arith.constant 0 : i32
    %c0_i32_0 = arith.constant 0 : i32
    %c0_i32_1 = arith.constant 0 : i32
    return %arg0, %c0_i32, %c0_i32_0 : i32, i32, i32
  }
  func.func @transform_6(%arg0: i32) -> (i32, i32, i32, i32) {
    %c0_i32 = arith.constant 0 : i32
    %c0_i32_0 = arith.constant 0 : i32
    %c0_i32_1 = arith.constant 0 : i32
    %c0_i32_2 = arith.constant 0 : i32
    return %arg0, %c0_i32, %c0_i32_0, %c0_i32_1 : i32, i32, i32, i32
  }
}

</mosaic_0001>

<bundles_post_ra>
// kernel: resblock_pallas.3
= control target key start
LH: loop header
LB: loop body
LE: loop exit
PB: predicated region body
PF: predicated region fallthrough
CT: control target
= control target key end

     0   :  { %11 = vsyncpa [#allocation3], 0  ;;  %s997_s0 = inlined_call_operand.vmem [shape: f32[2,8,8,128], index: 0, kind: input, shape index: {}]   ;;  %s998_s1 = inlined_call_operand.vmem [shape: bf16[2,8,8,128], index: 1, kind: input, shape index: {}]   ;;  %s999_s2 = inlined_call_operand.vmem [shape: bf16[128,128], index: 2, kind: input, shape index: {}]   ;;  %s1000_s3 = inlined_call_operand.vmem [shape: f32[1,128], index: 3, kind: input, shape index: {}]   ;;  %s1001_s4 = inlined_call_operand.vmem [shape: f32[2,1,128], index: 4, kind: input, shape index: {}]   ;;  %s1002_s5 = inlined_call_operand.vmem [shape: f32[2,1,128], index: 5, kind: input, shape index: {}]   ;;  %s1003_s6 = inlined_call_operand.hbm [shape: f32[2,8,8,128], index: 6, kind: output, shape index: {}]  }
   0x1   :  { %13 = vsyncpa [#allocation3 + $0x1], 0  ;;  %s845_s21 = smov 0   ;;  %s847_s22 = smov 0  }
   0x2   :  { %s849_s23 = smov 0   ;;  %s851_s24 = smov 0  }
   0x3 LB: > { %s866_s25 = sadd.s32 4294967295, %s806_s24   ;;  %s599_s26 = sadd.s32 4294967294, %s806_s24   ;;  %s806_s24 = sphi %s851_s24, %s1009_s24   ;;  %s802_s23 = sphi %s849_s23, %s1008_s23   ;;  %s798_s22 = sphi %s847_s22, %s1007_s22   ;;  %s794_s21 = sphi %s845_s21, %s1006_s21  }
   0x4   : > { %s870_s27 = sadd.s32 1, %s806_s24   ;;  %s172_s28 = sadd.s32 1, %s802_s23 }
   0x5   : > { %s169_s29 = ssub.s32 %s806_s24, %s870_s27  ;;  %p182_p0 = scmp.ne.s32.totalorder %s802_s23, %s798_s22 }
   0x6   : > { %p170_p1 = scmp.eq.s32.totalorder %s169_s29, 0  ;;  %p183_p2 = scmp.eq.s32.totalorder %s866_s25, 1 }
   0x7   : > { %p188_p3 = scmp.ne.s32.totalorder %s798_s22, %s794_s21  ;;  %p189_p4 = scmp.eq.s32.totalorder %s599_s26, 1 }
   0x8   : > { %s881_s30 = scalar_select %p170_p1, %s802_s23, %s172_s28  }
   0x9   : > { %p883_p5 = por %p183_p2, %p182_p0  ;;  %p887_p6 = por %p189_p4, %p188_p3 }
   0xa   : > { %p602_p7 = scmp.ge.s32.totalorder %s806_s24, 1  ;;  %p241_p8 = scmp.lt.s32.totalorder %s806_s24, 3 }
   0xc   : > { %p242_p9 = pnand %p602_p7, %p241_p8 }
   0xd   : > { %p282_p10 = scmp.lt.s32.totalorder (!%p242_p9), %s866_s25, 1  ;;  %s675_s28 = sshll.u32 (!%p242_p9), %s866_s25, 6 }
   0xe   : > { %245 = sbr.rel (%p242_p9) target bundleno = 203 (0xcb), region = 44  ;;  %s503_s10 = scalar_lea.hbm (!%p242_p9), %s1003_s6, %s675_s28 }
   0xf   : > { %s506_s11 = sshll.u32 (!%p242_p9), %s503_s10, 4  ;;  %s507_s11 = int_to_ptr.hbm [resolvable:$true] %s506_s11 }
  0x10   : > { %s758_s14 = sshra.s32 (!%p242_p9), %s507_s11, 4  ;;  %s759_s14 = int_to_ptr.hbm [resolvable:$true] %s758_s14 }
  0x11   : > { %p765_p0 = scmp.lt.s32.totalorder (!%p242_p9), %s759_s14, %s1003_s6 }
  0x13   : > { %v674_v0 = vld [vmem:[%s999_s2 + $0x38] sm:$0xff]  ;;  %v673_v1 = vld [vmem:[%s999_s2 + $0x30] sm:$0xff]  ;;  %s901_s13 = scalar_select %p282_p10, %s866_s25, 1  ;;  %v672_v2 = vld [vmem:[%s999_s2 + $0x28] sm:$0xff] }
  0x14   : > { %398 = vmatpush.bf16.msra.mxu0 %v674_v0  ;;  %676 = vmatpush.bf16.msra.mxu1 %v674_v0  ;;  %v671_v3 = vld [vmem:[%s999_s2 + $0x20] sm:$0xff]  ;;  %v670_v4 = vld [vmem:[%s999_s2 + $0x18] sm:$0xff]  ;;  %v669_v5 = vld [vmem:[%s999_s2 + $0x10] sm:$0xff] }
  0x15   : > { %677 = vmatpush.bf16.msra.mxu2 %v674_v0  ;;  %678 = vmatpush.bf16.msra.mxu3 %v674_v0  ;;  %s294_s16 = scalar_lea.vmem %s1001_s4, %s901_s13  ;;  %s297_s19 = scalar_lea.vmem %s1002_s5, %s901_s13  ;;  %v668_v6 = vld [vmem:[%s999_s2 + $0x8] sm:$0xff]  ;;  %v667_v7 = vld [vmem:[%s999_s2] sm:$0xff] }
  0x16   : > { %s662_s17 = sshll.u32 %s901_s13, 5  ;;  %s661_s9 = sshll.u32 %s901_s13, 6  ;;  %v741_v12 = vld [vmem:[%s294_s16] ss:$0 sm:$0xff] }
  0x17   : > { %s291_s29 = scalar_lea.vmem %s998_s1, %s662_s17  ;;  %s286_s15 = scalar_lea.vmem %s997_s0, %s661_s9  ;;  %v742_v13 = vld [vmem:[%s297_s19] ss:$0 sm:$0xff] }
  0x18   : > { %399 = vmatpush.bf16.msra.mxu0 %v673_v1  ;;  %679 = vmatpush.bf16.msra.mxu1 %v673_v1  ;;  %v663_v8 = vld [vmem:[%s291_s29] sm:$0xff]  ;;  %v664_v9 = vld [vmem:[%s291_s29 + $0x8] sm:$0xff]  ;;  %v665_v10 = vld [vmem:[%s291_s29 + $0x10] sm:$0xff]  ;;  %s279_s19 = sand.u32 1, %s798_s22   ;;  %s764_s13 = scalar_lea.hbm %s1003_s6, 128 }
  0x19   : > { %680 = vmatpush.bf16.msra.mxu2 %v673_v1  ;;  %681 = vmatpush.bf16.msra.mxu3 %v673_v1  ;;  %v666_v11 = vld [vmem:[%s291_s29 + $0x18] sm:$0xff]  ;;  %v437_v14 = vld [vmem:[%s286_s15] sm:$0xff]  ;;  %v439_v16 = vld [vmem:[%s286_s15 + $0x10] sm:$0xff]  ;;  %s603_s20 = sshll.u32 %s279_s19, 6  ;;  %s492_s12 = scalar_lea.sflag [#allocation3], %s279_s19 }
  0x1a   : > { %v448_v15 = vmul.f32 %v741_v12, %v437_v14  ;;  %v441_v17 = vld [vmem:[%s286_s15 + $0x20] sm:$0xff]  ;;  %v443_v18 = vld [vmem:[%s286_s15 + $0x30] sm:$0xff]  ;;  %v450_v20 = vmul.f32 %v741_v12, %v439_v16  ;;  %v438_v26 = vld [vmem:[%s286_s15 + $0x8] sm:$0xff]  ;;  %s953_s26 = scalar_lea.vmem [#allocation2], %s603_s20 }
  0x1b   : > { %v452_v21 = vmul.f32 %v741_v12, %v441_v17  ;;  %v454_v22 = vmul.f32 %v741_v12, %v443_v18  ;;  %v440_v27 = vld [vmem:[%s286_s15 + $0x18] sm:$0xff]  ;;  %v449_v28 = vmul.f32 %v741_v12, %v438_v26  ;;  %v442_v32 = vld [vmem:[%s286_s15 + $0x28] sm:$0xff]  ;;  %v743_v38 = vld [vmem:[%s1000_s3] ss:$0 sm:$0xff]  ;;  %s504_s25 = sshll.u32 %s953_s26, 4  ;;  %s505_s25 = int_to_ptr.vmem [resolvable:$true] %s504_s25 }
  0x1c   : > { %400 = vmatpush.bf16.msra.mxu0 %v672_v2  ;;  %682 = vmatpush.bf16.msra.mxu1 %v672_v2  ;;  %v459_v19 = vadd.f32 %v742_v13, %v448_v15  ;;  %v461_v23 = vadd.f32 %v742_v13, %v450_v20  ;;  %v451_v29 = vmul.f32 %v741_v12, %v440_v27  ;;  %v444_v33 = vld [vmem:[%s286_s15 + $0x38] sm:$0xff]  ;;  %s760_s15 = scalar_lea.hbm %s759_s14, 64 }
  0x1d   : > { %683 = vmatpush.bf16.msra.mxu2 %v672_v2  ;;  %684 = vmatpush.bf16.msra.mxu3 %v672_v2  ;;  %v463_v24 = vadd.f32 %v742_v13, %v452_v21  ;;  %v465_v25 = vadd.f32 %v742_v13, %v454_v22  ;;  %v460_v30 = vadd.f32 %v742_v13, %v449_v28  ;;  %p761_p11 = scmp.ne.s32.totalorder %s759_s14, %s760_s15  ;;  %p766_p1 = scmp.lt.s32.totalorder %s764_s13, %s760_s15 }
  0x1e   : > { %v462_v31 = vadd.f32 %v742_v13, %v451_v29  ;;  %v453_v34 = vmul.f32 %v741_v12, %v442_v32  ;;  %v455_v35 = vmul.f32 %v741_v12, %v444_v33  ;;  %v467_v42 = vmax.f32 %v459_v19, 0.0 }
  0x1f   : > { %v469_v44 = vmax.f32 %v461_v23, 0.0  ;;  %v471_v52 = vmax.f32 %v463_v24, 0.0  ;;  %v473_v54 = vmax.f32 %v465_v25, 0.0  ;;  %v468_v58 = vmax.f32 %v460_v30, 0.0  ;;  %p762_p12 = pnand %p761_p11, %p883_p5  ;;  %p767_p2 = por %p766_p1, %p765_p0 }
  0x20   : > { %401 = vmatpush.bf16.msra.mxu0 %v671_v3  ;;  %685 = vmatpush.bf16.msra.mxu1 %v671_v3  ;;  %v464_v36 = vadd.f32 %v742_v13, %v453_v34  ;;  %v466_v37 = vadd.f32 %v742_v13, %v455_v35  ;;  %v470_v60 = vmax.f32 %v462_v31, 0.0 }
  0x21   : > { %686 = vmatpush.bf16.msra.mxu2 %v671_v3  ;;  %687 = vmatpush.bf16.msra.mxu3 %v671_v3  ;;  %p763_p13 = pneg %p762_p12 }
  0x23   : > { %p768_p3 = pnand %p767_p2, %p763_p13 }
  0x24   : > { %402 = vmatpush.bf16.msra.mxu0 %v670_v4  ;;  %688 = vmatpush.bf16.msra.mxu1 %v670_v4 }
  0x25   : > { %689 = vmatpush.bf16.msra.mxu2 %v670_v4  ;;  %690 = vmatpush.bf16.msra.mxu3 %v670_v4 }
  0x28   : > { %403 = vmatpush.bf16.msra.mxu0 %v669_v5  ;;  %691 = vmatpush.bf16.msra.mxu1 %v669_v5 }
  0x29   : > { %692 = vmatpush.bf16.msra.mxu2 %v669_v5  ;;  %693 = vmatpush.bf16.msra.mxu3 %v669_v5 }
  0x2c   : > { %404 = vmatpush.bf16.msra.mxu0 %v668_v6  ;;  %694 = vmatpush.bf16.msra.mxu1 %v668_v6 }
  0x2d   : > { %695 = vmatpush.bf16.msra.mxu2 %v668_v6  ;;  %696 = vmatpush.bf16.msra.mxu3 %v668_v6 }
  0x30   : > { %405 = vmatpush.bf16.msra.mxu0 %v667_v7  ;;  %697 = vmatpush.bf16.msra.mxu1 %v667_v7 }
  0x31   : > { %698 = vmatpush.bf16.msra.mxu2 %v667_v7  ;;  %699 = vmatpush.bf16.msra.mxu3 %v667_v7 }
  0x33   : > { %406 = vmatmul.bf16.vlgmr.msra.gmra.mxu0 %v663_v8  ;;  %411 = vmatmul.bf16.vlgmr.msra.gmra.mxu1 %v664_v9  ;;  %v472_v8 = vmax.f32 %v464_v36, 0.0 }
  0x34   : > { %416 = vmatmul.bf16.vlgmr.msra.gmra.mxu2 %v665_v10  ;;  %421 = vmatmul.bf16.vlgmr.msra.gmra.mxu3 %v666_v11  ;;  %v474_v10 = vmax.f32 %v466_v37, 0.0 }
  0xb0   : > { %v407_v39 = vpop.f32.mrf.mxu0  ;;  %v412_v40 = vpop.f32.mrf.mxu1 }
  0xb1   : > { %v408_v41 = vadd.f32 %v743_v38, %v407_v39  ;;  %v413_v43 = vadd.f32 %v743_v38, %v412_v40 }
  0xb3   : > { %v427_v45 = vmax.f32 %v408_v41, 0.0  ;;  %v429_v46 = vmax.f32 %v413_v43, 0.0 }
  0xb5   : > { %v475_v47 = vadd.f32 %v467_v42, %v427_v45  ;;  %v477_v48 = vadd.f32 %v469_v44, %v429_v46 }
  0xb7   : > { %483 = vst [vmem:[%s953_s26] sm:$0xff] %v475_v47  ;;  %v417_v49 = vpop.f32.mrf.mxu2  ;;  %v422_v50 = vpop.f32.mrf.mxu3 }
  0xb8   : > { %485 = vst [vmem:[%s953_s26 + $0x10] sm:$0xff] %v477_v48  ;;  %v418_v51 = vadd.f32 %v743_v38, %v417_v49  ;;  %v423_v53 = vadd.f32 %v743_v38, %v422_v50  ;;  %v409_v55 = vpop.f32.mrf.mxu0  ;;  %v414_v56 = vpop.f32.mrf.mxu1 }
  0xb9   : > { %v410_v57 = vadd.f32 %v743_v38, %v409_v55  ;;  %v415_v59 = vadd.f32 %v743_v38, %v414_v56 }
  0xba   : > { %v431_v61 = vmax.f32 %v418_v51, 0.0  ;;  %v433_v62 = vmax.f32 %v423_v53, 0.0 }
  0xbb   : > { %v428_v63 = vmax.f32 %v410_v57, 0.0  ;;  %v430_v0 = vmax.f32 %v415_v59, 0.0 }
  0xbc   : > { %v479_v1 = vadd.f32 %v471_v52, %v431_v61  ;;  %v481_v2 = vadd.f32 %v473_v54, %v433_v62 }
  0xbd   : > { %v476_v3 = vadd.f32 %v468_v58, %v428_v63  ;;  %v478_v4 = vadd.f32 %v470_v60, %v430_v0 }
  0xbe   : > { %487 = vst [vmem:[%s953_s26 + $0x20] sm:$0xff] %v479_v1 }
  0xbf   : > { %489 = vst [vmem:[%s953_s26 + $0x30] sm:$0xff] %v481_v2  ;;  %v419_v5 = vpop.f32.mrf.mxu2  ;;  %v424_v6 = vpop.f32.mrf.mxu3 }
  0xc0   : > { %484 = vst [vmem:[%s953_s26 + $0x8] sm:$0xff] %v476_v3  ;;  %v420_v7 = vadd.f32 %v743_v38, %v419_v5  ;;  %v425_v9 = vadd.f32 %v743_v38, %v424_v6 }
  0xc1   : > { %486 = vst [vmem:[%s953_s26 + $0x18] sm:$0xff] %v478_v4 }
  0xc2   : > { %v432_v11 = vmax.f32 %v420_v7, 0.0  ;;  %v434_v12 = vmax.f32 %v425_v9, 0.0 }
  0xc4   : > { %v480_v13 = vadd.f32 %v472_v8, %v432_v11  ;;  %v482_v14 = vadd.f32 %v474_v10, %v434_v12 }
  0xc6   : > { %488 = vst [vmem:[%s953_s26 + $0x28] sm:$0xff] %v480_v13 }
  0xc7   : > { %490 = vst [vmem:[%s953_s26 + $0x38] sm:$0xff] %v482_v14 }
  0xc8   : > { %771 = shalt.err (!%p768_p3)
}
  0xc9   : > { %s808_s19 = smov 128   ;;  %s809_s26 = smov 8  }
  0xca   : > { %700 = dma.vmem_to_hbm [thread:$0]  (%p883_p5), %s505_s25, 1024, %s507_s11, %s492_s12, %s808_s19, %s808_s19, %s809_s26  }
  0xcb PF: > { %p706_p4 = scmp.ge.s32.totalorder %s806_s24, 2  ;;  %s521_s28 = sand.u32 1, %s794_s21  }
  0xcc   : > { %s522_s29 = scalar_lea.sflag [#allocation3], %s521_s28 }
  0xcd   : > { %p703_p7 = pnand %p706_p4, %p887_p6 }
  0xcf   : > { %p704_p8 = pneg %p703_p7 }
  0xd1   : > { %789 = dma.done.wait (%p704_p8), %s522_s29, 1024  }
  0xd2   : > { %791 = vsyncadd (%p704_p8), %s522_s29, 4294966272  ;;  %p16_p9 = scmp.ge.s32.totalorder %s870_s27, 4   ;;  %s1006_s21 = smov %s798_s22 }
  0xd3   : > { %s1007_s22 = smov %s802_s23  ;;  %s1008_s23 = smov %s881_s30 }
  0xd4   : > { %s1009_s24 = smov %s870_s27  ;;  %18 = sbr.rel (!%p16_p9) target bundleno = 3 (0x3), region = 88 }
  0xd9   :  { %528 = vsyncpa [#allocation3], 1 }
  0xda   :  { %530 = vsyncpa [#allocation3 + $0x1], 1 }

// kernel: resblock_pallas.2
= control target key start
LH: loop header
LB: loop body
LE: loop exit
PB: predicated region body
PF: predicated region fallthrough
CT: control target
= control target key end

     0   :  { %13 = vsyncpa [#allocation3], 0  ;;  %s3411_s0 = inlined_call_operand.vmem [shape: bf16[2,8,8,128], index: 0, kind: input, shape index: {}]   ;;  %s3412_s1 = inlined_call_operand.vmem [shape: bf16[128,128], index: 1, kind: input, shape index: {}]   ;;  %s3413_s2 = inlined_call_operand.hbm [shape: f32[1,128], index: 2, kind: input, shape index: {}]   ;;  %s3414_s3 = inlined_call_operand.vmem [shape: bf16[9,128,128], index: 3, kind: input, shape index: {}]   ;;  %s3415_s4 = inlined_call_operand.hbm [shape: f32[1,128], index: 4, kind: input, shape index: {}]   ;;  %s3416_s5 = inlined_call_operand.vmem [shape: f32[2,8,8,128], index: 5, kind: output, shape index: {0}]   ;;  %s3417_s6 = inlined_call_operand.vmem [shape: f32[2,1,128], index: 6, kind: output, shape index: {1}]   ;;  %s3418_s7 = inlined_call_operand.vmem [shape: f32[2,1,128], index: 7, kind: output, shape index: {2}]  }
   0x1   :  { %14 = vsyncpa [#allocation5], 0  ;;  %s2701_s24 = smov 0  }
   0x2 LB: > { %s228_s27 = sshll.u32 %s3413_s2, 4  ;;  %s2710_s28 = sadd.s32 4294967295, %s2656_s24   ;;  %s2656_s24 = sphi %s2701_s24, %s20_s24   ;;  %s229_s27 = int_to_ptr.hbm [resolvable:$true] %s228_s27 }
   0x3   : > { %p1962_p0 = scmp.ge.s32.totalorder %s2656_s24, 1  ;;  %p213_p1 = scmp.lt.s32.totalorder %s2656_s24, 3 }
   0x4   : > { %p2565_p2 = scmp.eq.s32.totalorder %s2710_s28, 0  ;;  %s2658_s30 = smov [#allocation2]  }
   0x5   : > { %p2715_p3 = pnand %p1962_p0, %p213_p1  ;;  %s230_s8 = sshll.u32 %s2658_s30, 4  ;;  %s231_s8 = int_to_ptr.vmem [resolvable:$true] %s230_s8 }
   0x6   : > { %s243_s11 = sshll.u32 %s3415_s4, 4  ;;  %s2659_s12 = smov [#allocation4]   ;;  %s244_s11 = int_to_ptr.hbm [resolvable:$true] %s243_s11 }
   0x7   : > { %p2558_p4 = pneg %p2715_p3  ;;  %s245_s13 = sshll.u32 %s2659_s12, 4  ;;  %s246_s13 = int_to_ptr.vmem [resolvable:$true] %s245_s13 }
   0x8   : > { %266 = sbr.rel (%p2715_p3) target bundleno = 572 (0x23c), region = 40 }
   0x9   : > { %p2559_p5 = pnand %p2565_p2, %p2558_p4 }
   0xb   : > { %2561 = dma.hbm_to_vmem [thread:$0]  (!%p2559_p5), %s229_s27, 16, %s231_s8, [#allocation3]  }
   0xc   : > { %2564 = dma.hbm_to_vmem [thread:$0]  (!%p2559_p5), %s244_s11, 16, %s246_s13, [#allocation5]  }
   0xd   : > { %2647 = dma.done.wait (%p2565_p2), [#allocation3], 16  }
   0xe   : > { %2649 = vsyncadd (%p2565_p2), [#allocation3], 4294967280 }
   0xf   : > { %2651 = dma.done.wait (%p2565_p2), [#allocation5], 16  }
  0x10   : > { %2653 = vsyncadd (%p2565_p2), [#allocation5], 4294967280  ;;  %v2461_v0 = vld [vmem:[%s3412_s1 + $0x38] sm:$0xff]  ;;  %v2460_v1 = vld [vmem:[%s3412_s1 + $0x30] sm:$0xff]  ;;  %p310_p6 = scmp.lt.s32.totalorder %s2710_s28, 1  ;;  %v2660_v36 = vmov 0  }
  0x11   : > { %427 = vmatpush.bf16.msra.mxu0 %v2461_v0  ;;  %2534 = vmatpush.bf16.msra.mxu2 %v2461_v0  ;;  %v2459_v2 = vld [vmem:[%s3412_s1 + $0x28] sm:$0xff]  ;;  %v2458_v3 = vld [vmem:[%s3412_s1 + $0x20] sm:$0xff]  ;;  %v2457_v4 = vld [vmem:[%s3412_s1 + $0x18] sm:$0xff]  ;;  %v2839_v37 = vunpack.c.l.b16 %v2660_v36  ;;  %v607_v54 = vunpack.c.h.b16 %v2660_v36  ;;  %vm560_vm0 = vcmask 1040384   ;;  %vm561_vm1 = vsmask.f32 256 }
  0x12   : > { %v2456_v5 = vld [vmem:[%s3412_s1 + $0x10] sm:$0xff]  ;;  %s3429_s28 = smov (!%p310_p6, %s2710_s28), 1  ;;  %v2455_v6 = vld [vmem:[%s3412_s1 + $0x8] sm:$0xff]  ;;  %v2454_v7 = vld [vmem:[%s3412_s1] sm:$0xff]  ;;  %vm571_vm2 = vcmask 1044480   ;;  %vm948_vm9 = vcmask 1042432  }
  0x13   : > { %s2448_s30 = sshll.u32 %s3429_s28, 5  ;;  %v2469_v8 = vld [vmem:[%s3414_s3 + $0x38] sm:$0xff]  ;;  %v2468_v11 = vld [vmem:[%s3414_s3 + $0x30] sm:$0xff]  ;;  %v2467_v14 = vld [vmem:[%s3414_s3 + $0x28] sm:$0xff]  ;;  %v2847_v41 = vpack.c.b16 %v2839_v37, %v2839_v37  ;;  %vm572_vm3 = vsmask.f32 4352  ;;  %v2859_v0 = vpack.c.b16 %v607_v54, %v607_v54  ;;  %s322_s16 = scalar_lea.vmem %s3417_s6, %s3429_s28 }
  0x14   : > { %s314_s12 = scalar_lea.vmem %s3411_s0, %s2448_s30  ;;  %v2493_v15 = vld [vmem:[%s3414_s3 + $0xf8] sm:$0xff]  ;;  %v2466_v16 = vld [vmem:[%s3414_s3 + $0x20] sm:$0xff]  ;;  %v2492_v17 = vld [vmem:[%s3414_s3 + $0xf0] sm:$0xff]  ;;  %vm638_vm6 = vsmask.f32 3328  ;;  %vm949_vm10 = vcmask 1046532   ;;  %s325_s19 = scalar_lea.vmem %s3418_s7, %s3429_s28 }
  0x15   : > { %428 = vmatpush.bf16.msra.mxu0 %v2460_v1  ;;  %2535 = vmatpush.bf16.msra.mxu2 %v2460_v1  ;;  %v2450_v9 = vld [vmem:[%s314_s12] sm:$0xff]  ;;  %v2452_v10 = vld [vmem:[%s314_s12 + $0x10] sm:$0xff]  ;;  %v2451_v12 = vld [vmem:[%s314_s12 + $0x8] sm:$0xff]  ;;  %v642_v45 = vshrl.u32 %v2847_v41, 16  ;;  %v645_v46 = vshll.u32 %v2847_v41, 16  ;;  %s2449_s10 = sshll.u32 %s3429_s28, 6 }
  0x16   : > { %v2453_v13 = vld [vmem:[%s314_s12 + $0x18] sm:$0xff]  ;;  %v2491_v20 = vld [vmem:[%s3414_s3 + $0xe8] sm:$0xff]  ;;  %v2476_v21 = vld [vmem:[%s3414_s3 + $0x70] sm:$0xff]  ;;  %vm639_vm7 = vsmask.f32 7440  ;;  %s3342_s13 = scalar_lea.vmem %s3416_s5, %s2449_s10 }
  0x17   : > { %v2477_v18 = vld [vmem:[%s3414_s3 + $0x78] sm:$0xff]  ;;  %v2464_v22 = vld [vmem:[%s3414_s3 + $0x10] sm:$0xff]  ;;  %v2490_v23 = vld [vmem:[%s3414_s3 + $0xe0] sm:$0xff]  ;;  %v644_v55 = vrot.slane %v642_v45, 4  ;;  %v647_v56 = vrot.slane %v645_v46, 5 }
  0x18   : > { %834 = vmatpush.bf16.msra.mxu1 %v2477_v18  ;;  %2542 = vmatpush.bf16.msra.mxu3 %v2477_v18  ;;  %v2465_v19 = vld [vmem:[%s3414_s3 + $0x18] sm:$0xff]  ;;  %v2475_v24 = vld [vmem:[%s3414_s3 + $0x68] sm:$0xff]  ;;  %v2474_v27 = vld [vmem:[%s3414_s3 + $0x60] sm:$0xff] }
  0x19   : > { %429 = vmatpush.bf16.msra.mxu0 %v2459_v2  ;;  %2536 = vmatpush.bf16.msra.mxu2 %v2459_v2  ;;  %v2463_v25 = vld [vmem:[%s3414_s3 + $0x8] sm:$0xff]  ;;  %v2489_v26 = vld [vmem:[%s3414_s3 + $0xd8] sm:$0xff]  ;;  %v2462_v28 = vld [vmem:[%s3414_s3] sm:$0xff] }
  0x1a   : > { %v2488_v29 = vld [vmem:[%s3414_s3 + $0xd0] sm:$0xff]  ;;  %v2473_v30 = vld [vmem:[%s3414_s3 + $0x58] sm:$0xff]  ;;  %v2487_v31 = vld [vmem:[%s3414_s3 + $0xc8] sm:$0xff] }
  0x1b   : > { %v2472_v32 = vld [vmem:[%s3414_s3 + $0x50] sm:$0xff]  ;;  %v2486_v33 = vld [vmem:[%s3414_s3 + $0xc0] sm:$0xff]  ;;  %v2471_v34 = vld [vmem:[%s3414_s3 + $0x48] sm:$0xff] }
  0x1c   : > { %835 = vmatpush.bf16.msra.mxu1 %v2476_v21  ;;  %2543 = vmatpush.bf16.msra.mxu3 %v2476_v21  ;;  %v2837_v35 = vld [vmem:[#allocation2] ss:$0 sm:$0xff]  ;;  %v2501_v50 = vld [vmem:[%s3414_s3 + $0x138] sm:$0xff]  ;;  %v2500_v60 = vld [vmem:[%s3414_s3 + $0x130] sm:$0xff] }
  0x1d   : > { %430 = vmatpush.bf16.msra.mxu0 %v2458_v3  ;;  %2537 = vmatpush.bf16.msra.mxu2 %v2458_v3  ;;  %v2470_v39 = vld [vmem:[%s3414_s3 + $0x40] sm:$0xff]  ;;  %vm2861_vm4 = vmand %vm560_vm0, %vm561_vm1  ;;  %v648_v3 = vor.u32 %v647_v56, %v644_v55  ;;  %v2497_v46 = vld [vmem:[%s3414_s3 + $0x118] sm:$0xff] }
  0x1e   : > { %vm2870_vm5 = vmand %vm571_vm2, %vm572_vm3  ;;  %v2496_v56 = vld [vmem:[%s3414_s3 + $0x110] sm:$0xff] }
  0x1f   : > { %vm2894_vm8 = vmor %vm638_vm6, %vm639_vm7  ;;  %v2516_v1 = vld [vmem:[%s3414_s3 + $0x1b0] sm:$0xff] }
  0x20   : > { %836 = vmatpush.bf16.msra.mxu1 %v2475_v24  ;;  %2544 = vmatpush.bf16.msra.mxu3 %v2475_v24  ;;  %vm3195_vm11 = vmor %vm948_vm9, %vm949_vm10 }
  0x21   : > { %431 = vmatpush.bf16.msra.mxu0 %v2457_v4  ;;  %2538 = vmatpush.bf16.msra.mxu2 %v2457_v4  ;;  %v2499_v4 = vld [vmem:[%s3414_s3 + $0x128] sm:$0xff] }
  0x24   : > { %837 = vmatpush.bf16.msra.mxu1 %v2474_v27  ;;  %2545 = vmatpush.bf16.msra.mxu3 %v2474_v27 }
  0x25   : > { %432 = vmatpush.bf16.msra.mxu0 %v2456_v5  ;;  %2539 = vmatpush.bf16.msra.mxu2 %v2456_v5 }
  0x28   : > { %838 = vmatpush.bf16.msra.mxu1 %v2473_v30  ;;  %2546 = vmatpush.bf16.msra.mxu3 %v2473_v30 }
  0x29   : > { %433 = vmatpush.bf16.msra.mxu0 %v2455_v6  ;;  %2540 = vmatpush.bf16.msra.mxu2 %v2455_v6 }
  0x2c   : > { %839 = vmatpush.bf16.msra.mxu1 %v2472_v32  ;;  %2547 = vmatpush.bf16.msra.mxu3 %v2472_v32 }
  0x2d   : > { %434 = vmatpush.bf16.msra.mxu0 %v2454_v7  ;;  %2541 = vmatpush.bf16.msra.mxu2 %v2454_v7 }
  0x30   : > { %435 = vmatmul.bf16.vlgmr.msra.gmra.mxu0 %v2450_v9  ;;  %445 = vmatmul.bf16.vlgmr.msra.gmra.mxu2 %v2452_v10  ;;  %v651_v9 = vshll.u32 %v2859_v0, 16 }
  0x31   : > { %919 = vmatpush.bf16.msrb.mxu2 %v2469_v8  ;;  %1176 = vmatpush.bf16.msrb.mxu0 %v2493_v15  ;;  %v2532_v8 = vld [vmem:[%s3414_s3 + $0x230] sm:$0xff] }
  0x32   : > { %840 = vmatpush.bf16.msra.mxu1 %v2471_v34  ;;  %2548 = vmatpush.bf16.msra.mxu3 %v2471_v34  ;;  %v2885_v21 = vrot.slane %v651_v9, 5 }
  0x35   : > { %920 = vmatpush.bf16.msrb.mxu2 %v2468_v11  ;;  %1177 = vmatpush.bf16.msrb.mxu0 %v2492_v17  ;;  %v2498_v17 = vld [vmem:[%s3414_s3 + $0x120] sm:$0xff] }
  0x36   : > { %841 = vmatpush.bf16.msra.mxu1 %v2470_v39  ;;  %2549 = vmatpush.bf16.msra.mxu3 %v2470_v39 }
  0x39   : > { %921 = vmatpush.bf16.msrb.mxu2 %v2467_v14  ;;  %1178 = vmatpush.bf16.msrb.mxu0 %v2491_v20  ;;  %v2883_v20 = vrot.slane %v648_v3, 4 }
  0x3a   : > { %1304 = vmatpush.bf16.msrb.mxu1 %v2501_v50 }
  0x3b   : > { %v654_v50 = vsel %vm2894_vm8, %v2883_v20, %v2885_v21 }
  0x3d   : > { %922 = vmatpush.bf16.msrb.mxu2 %v2466_v16  ;;  %1179 = vmatpush.bf16.msrb.mxu0 %v2490_v23 }
  0x3e   : > { %1305 = vmatpush.bf16.msrb.mxu1 %v2500_v60 }
  0x40   : > { %440 = vmatmul.bf16.gmra.mxu0 %v2451_v12  ;;  %450 = vmatmul.bf16.gmra.mxu2 %v2453_v13 }
  0x41   : > { %923 = vmatpush.bf16.msrb.mxu2 %v2465_v19  ;;  %1180 = vmatpush.bf16.msrb.mxu0 %v2489_v26 }
  0x42   : > { %1306 = vmatpush.bf16.msrb.mxu1 %v2499_v4 }
  0x45   : > { %924 = vmatpush.bf16.msrb.mxu2 %v2464_v22  ;;  %1181 = vmatpush.bf16.msrb.mxu0 %v2488_v29 }
  0x46   : > { %1307 = vmatpush.bf16.msrb.mxu1 %v2498_v17  ;;  %v2485_v17 = vld [vmem:[%s3414_s3 + $0xb8] sm:$0xff] }
  0x47   : > { %1064 = vmatpush.bf16.msrb.mxu3 %v2485_v17 }
  0x49   : > { %925 = vmatpush.bf16.msrb.mxu2 %v2463_v25  ;;  %1182 = vmatpush.bf16.msrb.mxu0 %v2487_v31 }
  0x4a   : > { %1308 = vmatpush.bf16.msrb.mxu1 %v2497_v46 }
  0x4d   : > { %926 = vmatpush.bf16.msrb.mxu2 %v2462_v28  ;;  %1183 = vmatpush.bf16.msrb.mxu0 %v2486_v33 }
  0x4e   : > { %1309 = vmatpush.bf16.msrb.mxu1 %v2496_v56 }
  0xad   : > { %v436_v38 = vpop.f32.mrf.mxu0 }
  0xae   : > { %v437_v40 = vadd.f32 %v2837_v35, %v436_v38 }
  0xb0   : > { %v456_v42 = vmax.f32 %v437_v40, 0.0 }
  0xb2   : > { %v464_v43 = vpack.c.bf16 %v456_v42, %v456_v42 }
  0xb3   : > { %v446_v44 = vpop.f32.mrf.mxu2 }
  0xb4   : > { %v480_v47 = vunpack.c.l.b16 %v464_v43  ;;  %v447_v48 = vadd.f32 %v2837_v35, %v446_v44 }
  0xb5   : > { %v438_v49 = vpop.f32.mrf.mxu0 }
  0xb6   : > { %v488_v51 = vpack.c.b16 %v480_v47, %v480_v47  ;;  %v460_v52 = vmax.f32 %v447_v48, 0.0  ;;  %v439_v53 = vadd.f32 %v2837_v35, %v438_v49 }
  0xb8   : > { %v497_v57 = vshrl.u32 %v488_v51, 16  ;;  %v457_v58 = vmax.f32 %v439_v53, 0.0  ;;  %v468_v59 = vpack.c.bf16 %v460_v52, %v460_v52  ;;  %v500_v62 = vshll.u32 %v488_v51, 16  ;;  %v2509_v51 = vld [vmem:[%s3414_s3 + $0x178] sm:$0xff] }
  0xb9   : > { %1419 = vmatpush.bf16.msra.mxu2 %v2509_v51 }
  0xba   : > { %v499_v61 = vrot.slane %v497_v57, 7  ;;  %v465_v63 = vpack.c.bf16 %v457_v58, %v457_v58  ;;  %v484_v10 = vunpack.c.l.b16 %v468_v59 }
  0xbb   : > { %v448_v2 = vpop.f32.mrf.mxu2 }
  0xbc   : > { %v502_v5 = vor.u32 %v500_v62, %v499_v61  ;;  %v481_v6 = vunpack.c.l.b16 %v465_v63  ;;  %v449_v7 = vadd.f32 %v2837_v35, %v448_v2  ;;  %v2887_v22 = vpack.c.b16 %v484_v10, %v484_v10 }
  0xbd   : > { %v441_v11 = vpop.f32.mrf.mxu0 }
  0xbe   : > { %v563_v12 = vsel %vm2861_vm4, 0, %v502_v5  ;;  %v489_v13 = vpack.c.b16 %v481_v6, %v481_v6  ;;  %v461_v14 = vmax.f32 %v449_v7, 0.0  ;;  %v442_v15 = vadd.f32 %v2837_v35, %v441_v11 }
  0xbf   : > { %v574_v16 = vsel %vm2870_vm5, %v563_v12, 0  ;;  %v525_v40 = vshrl.u32 %v2887_v22, 16  ;;  %v528_v52 = vshll.u32 %v2887_v22, 16 }
  0xc0   : > { %v504_v18 = vshrl.u32 %v489_v13, 16  ;;  %v608_v19 = vunpack.c.l.b16 %v574_v16  ;;  %v469_v23 = vpack.c.bf16 %v461_v14, %v461_v14  ;;  %v458_v24 = vmax.f32 %v442_v15, 0.0 }
  0xc1   : > { %v609_v25 = vunpack.c.h.b16 %v574_v16  ;;  %v507_v27 = vshll.u32 %v489_v13, 16  ;;  %v527_v61 = vrot.slane %v525_v40, 7 }
  0xc2   : > { %v506_v26 = vrot.slane %v504_v18, 7  ;;  %v2889_v28 = vpack.c.b16 %v608_v19, %v608_v19  ;;  %v863_v29 = vpack.c.b16 %v608_v19, %v2839_v37  ;;  %v485_v30 = vunpack.c.l.b16 %v469_v23  ;;  %v2508_v18 = vld [vmem:[%s3414_s3 + $0x170] sm:$0xff] }
  0xc3   : > { %v466_v31 = vpack.c.bf16 %v458_v24, %v458_v24  ;;  %v451_v32 = vpop.f32.mrf.mxu2  ;;  %v2899_v38 = vpack.c.b16 %v609_v25, %v609_v25  ;;  %1420 = vmatpush.bf16.msra.mxu2 %v2508_v18 }
  0xc4   : > { %v509_v34 = vor.u32 %v507_v27, %v506_v26  ;;  %v452_v36 = vadd.f32 %v2837_v35, %v451_v32  ;;  %927 = vmatmul.bf16.vlgmr.msrb.gmra.mxu2 %v863_v29  ;;  %v656_v39 = vshrl.u32 %v2889_v28, 16  ;;  %v2903_v42 = vpack.c.b16 %v485_v30, %v485_v30  ;;  %v2484_v27 = vld [vmem:[%s3414_s3 + $0xb0] sm:$0xff]  ;;  %v2507_v29 = vld [vmem:[%s3414_s3 + $0x168] sm:$0xff] }
  0xc5   : > { %v482_v43 = vunpack.c.l.b16 %v466_v31  ;;  %v443_v44 = vpop.f32.mrf.mxu0  ;;  %v659_v45 = vshll.u32 %v2889_v28, 16  ;;  %v665_v60 = vshll.u32 %v2899_v38, 16  ;;  %v2952_v26 = vunpack.c.l.b16 %v654_v50  ;;  %1065 = vmatpush.bf16.msrb.mxu3 %v2484_v27 }
  0xc6   : > { %v564_v47 = vsel %vm2861_vm4, 0, %v509_v34  ;;  %v462_v48 = vmax.f32 %v452_v36, 0.0  ;;  %v444_v49 = vadd.f32 %v2837_v35, %v443_v44  ;;  %v658_v55 = vrot.slane %v656_v39, 4  ;;  %v2494_v36 = vld [vmem:[%s3414_s3 + $0x100] sm:$0xff] }
  0xc7   : > { %v490_v53 = vpack.c.b16 %v482_v43, %v482_v43  ;;  %v575_v54 = vsel %vm2870_vm5, %v564_v47, 0  ;;  %v532_v62 = vshrl.u32 %v2903_v42, 16  ;;  %v661_v2 = vrot.slane %v659_v45, 5  ;;  %1421 = vmatpush.bf16.msra.mxu2 %v2507_v29 }
  0xc8   : > { %v470_v57 = vpack.c.bf16 %v462_v48, %v462_v48  ;;  %v459_v58 = vmax.f32 %v444_v49, 0.0  ;;  %v2925_v59 = vunpack.c.l.b16 %v575_v54  ;;  %v611_v10 = vunpack.c.h.b16 %v575_v54 }
  0xc9   : > { %v511_v63 = vshrl.u32 %v490_v53, 16  ;;  %v514_v9 = vshll.u32 %v490_v53, 16  ;;  %v662_v12 = vor.u32 %v661_v2, %v658_v55  ;;  %v667_v16 = vrot.slane %v665_v60, 5  ;;  %v2506_v2 = vld [vmem:[%s3414_s3 + $0x160] sm:$0xff] }
  0xca   : > { %v486_v3 = vunpack.c.l.b16 %v470_v57  ;;  %v467_v4 = vpack.c.bf16 %v459_v58, %v459_v58  ;;  %v2931_v5 = vpack.c.b16 %v2925_v59, %v2925_v59  ;;  %v1120_v6 = vpack.c.b16 %v2925_v59, %v608_v19  ;;  %v2495_v19 = vld [vmem:[%s3414_s3 + $0x108] sm:$0xff] }
  0xcb   : > { %v513_v7 = vrot.slane %v511_v63, 7  ;;  %v453_v11 = vpop.f32.mrf.mxu2  ;;  %v663_v21 = vrot.slane %v662_v12, 4  ;;  %1310 = vmatpush.bf16.msrb.mxu1 %v2495_v19  ;;  %v530_v39 = vor.u32 %v528_v52, %v527_v61  ;;  %v534_v40 = vrot.slane %v532_v62, 7  ;;  %1422 = vmatpush.bf16.msra.mxu2 %v2506_v2  ;;  %v2503_v2 = vld [vmem:[%s3414_s3 + $0x148] sm:$0xff] }
  0xcc   : > { %v2934_v13 = vpack.c.b16 %v486_v3, %v486_v3  ;;  %v483_v14 = vunpack.c.l.b16 %v467_v4  ;;  %1184 = vmatmul.bf16.vlgmr.msrb.gmra.mxu0 %v1120_v6  ;;  %v454_v15 = vadd.f32 %v2837_v35, %v453_v11  ;;  %v670_v22 = vshrl.u32 %v2931_v5, 16  ;;  %v2525_v35 = vld [vmem:[%s3414_s3 + $0x1f8] sm:$0xff]  ;;  %v2524_v3 = vld [vmem:[%s3414_s3 + $0x1f0] sm:$0xff] }
  0xcd   : > { %v516_v20 = vor.u32 %v514_v9, %v513_v7  ;;  %v673_v23 = vshll.u32 %v2931_v5, 16  ;;  %v668_v30 = vsel %vm2894_vm8, %v663_v21, %v667_v16  ;;  %1627 = vmatpush.bf16.msra.mxu0 %v2525_v35  ;;  %v535_v43 = vshll.u32 %v2903_v42, 16  ;;  %v2483_v42 = vld [vmem:[%s3414_s3 + $0xa8] sm:$0xff]  ;;  %v2482_v9 = vld [vmem:[%s3414_s3 + $0xa0] sm:$0xff] }
  0xce   : > { %v539_v24 = vshrl.u32 %v2934_v13, 16  ;;  %v491_v25 = vpack.c.b16 %v483_v14, %v483_v14  ;;  %v672_v32 = vrot.slane %v670_v22, 4  ;;  %v463_v45 = vmax.f32 %v454_v15, 0.0  ;;  %1066 = vmatpush.bf16.msrb.mxu3 %v2483_v42  ;;  %v2505_v14 = vld [vmem:[%s3414_s3 + $0x158] sm:$0xff]  ;;  %v2523_v15 = vld [vmem:[%s3414_s3 + $0x1e8] sm:$0xff] }
  0xcf   : > { %v565_v31 = vsel %vm2861_vm4, 0, %v516_v20  ;;  %v675_v34 = vrot.slane %v673_v23, 5  ;;  %v2968_v46 = vunpack.c.l.b16 %v668_v30  ;;  %v2972_v48 = vpack.c.b16 %v611_v10, %v611_v10  ;;  %1311 = vmatpush.bf16.msrb.mxu1 %v2494_v36  ;;  %1423 = vmatpush.bf16.msra.mxu2 %v2505_v14 }
  0xd0   : > { %v518_v44 = vshrl.u32 %v491_v25, 16  ;;  %v576_v47 = vsel %vm2870_vm5, %v565_v31, 0  ;;  %v542_v49 = vshll.u32 %v2934_v13, 16  ;;  %v521_v51 = vshll.u32 %v491_v25, 16 }
  0xd1   : > { %v612_v53 = vunpack.c.l.b16 %v576_v47  ;;  %v541_v52 = vrot.slane %v539_v24, 7  ;;  %v778_v54 = vpack.c.b16 %v2968_v46, %v2952_v26  ;;  %v613_v55 = vunpack.c.h.b16 %v576_v47  ;;  %1628 = vmatpush.bf16.msra.mxu0 %v2524_v3  ;;  %v2521_v3 = vld [vmem:[%s3414_s3 + $0x1d8] sm:$0xff] }
  0xd2   : > { %v520_v50 = vrot.slane %v518_v44, 7  ;;  %v676_v56 = vor.u32 %v675_v34, %v672_v32  ;;  %v537_v61 = vor.u32 %v535_v43, %v534_v40  ;;  %v471_v62 = vpack.c.bf16 %v463_v45, %v463_v45  ;;  %1067 = vmatpush.bf16.msrb.mxu3 %v2482_v9  ;;  %v2481_v43 = vld [vmem:[%s3414_s3 + $0x98] sm:$0xff]  ;;  %v2504_v44 = vld [vmem:[%s3414_s3 + $0x150] sm:$0xff]  ;;  %v2522_v45 = vld [vmem:[%s3414_s3 + $0x1e0] sm:$0xff] }
  0xd3   : > { %v2980_v58 = vpack.c.b16 %v612_v53, %v612_v53  ;;  %v2983_v60 = vpack.c.b16 %v612_v53, %v2925_v59  ;;  %842 = vmatmul.bf16.vlgmr.msra.gmra.mxu1 %v778_v54  ;;  %v2985_v63 = vpack.c.b16 %v613_v55, %v613_v55  ;;  %v679_v59 = vshll.u32 %v2972_v48, 16  ;;  %v2480_v55 = vld [vmem:[%s3414_s3 + $0x90] sm:$0xff]  ;;  %1424 = vmatpush.bf16.msra.mxu2 %v2504_v44 }
  0xd4   : > { %v523_v57 = vor.u32 %v521_v51, %v520_v50  ;;  %v567_v7 = vsel %vm2861_vm4, 0, %v530_v39  ;;  %v3003_v10 = vor.u32 %v542_v49, %v541_v52  ;;  %v677_v12 = vrot.slane %v676_v56, 4 }
  0xd5   : > { %932 = vmatmul.bf16.gmra.mxu2 %v2983_v60  ;;  %v684_v6 = vshrl.u32 %v2980_v58, 16  ;;  %v687_v13 = vshll.u32 %v2980_v58, 16  ;;  %v693_v19 = vshll.u32 %v2985_v63, 16  ;;  %v487_v20 = vunpack.c.l.b16 %v471_v62  ;;  %1629 = vmatpush.bf16.msra.mxu0 %v2523_v15 }
  0xd6   : > { %v566_v4 = vsel %vm2861_vm4, 0, %v523_v57  ;;  %v578_v22 = vsel %vm2870_vm5, %v567_v7, 0  ;;  %v568_v23 = vsel %vm2861_vm4, 0, %v537_v61  ;;  %v681_v27 = vrot.slane %v679_v59, 5  ;;  %1068 = vmatpush.bf16.msrb.mxu3 %v2481_v43 }
  0xd7   : > { %v577_v11 = vsel %vm2870_vm5, %v566_v4, 0  ;;  %v686_v18 = vrot.slane %v684_v6, 4  ;;  %v689_v21 = vrot.slane %v687_v13, 5  ;;  %v3028_v30 = vunpack.c.l.b16 %v578_v22  ;;  %1425 = vmatpush.bf16.msra.mxu2 %v2503_v2 }
  0xd8   : > { %v3014_v16 = vunpack.c.l.b16 %v577_v11  ;;  %v615_v17 = vunpack.c.h.b16 %v577_v11  ;;  %v617_v31 = vunpack.c.h.b16 %v578_v22  ;;  %v3032_v32 = vsel %vm2870_vm5, %v568_v23, 0 }
  0xd9   : > { %v690_v29 = vor.u32 %v689_v21, %v686_v18  ;;  %v682_v34 = vsel %vm2894_vm8, %v677_v12, %v681_v27  ;;  %v695_v36 = vrot.slane %v693_v19, 5  ;;  %v3049_v49 = vpack.c.b16 %v3028_v30, %v3028_v30  ;;  %1630 = vmatpush.bf16.msra.mxu0 %v2522_v45  ;;  %v2519_v45 = vld [vmem:[%s3414_s3 + $0x1c8] sm:$0xff] }
  0xda   : > { %v3023_v35 = vpack.c.b16 %v3014_v16, %v3014_v16  ;;  %v3025_v24 = vpack.c.b16 %v615_v17, %v615_v17  ;;  %v1121_v25 = vpack.c.b16 %v3014_v16, %v612_v53  ;;  %v3051_v50 = vpack.c.b16 %v617_v31, %v617_v31  ;;  %1069 = vmatpush.bf16.msrb.mxu3 %v2480_v55  ;;  %v2479_v17 = vld [vmem:[%s3414_s3 + $0x88] sm:$0xff] }
  0xdb   : > { %v691_v47 = vrot.slane %v690_v29, 4  ;;  %v3054_v51 = vunpack.c.l.b16 %v3032_v32  ;;  %v3056_v53 = vpack.c.b16 %v487_v20, %v487_v20  ;;  %v712_v57 = vshrl.u32 %v3049_v49, 16 }
  0xdc   : > { %1189 = vmatmul.bf16.gmra.mxu0 %v1121_v25  ;;  %v698_v39 = vshrl.u32 %v3023_v35, 16  ;;  %v701_v40 = vshll.u32 %v3023_v35, 16  ;;  %v707_v54 = vshll.u32 %v3025_v24, 16  ;;  %v715_v61 = vshll.u32 %v3049_v49, 16 }
  0xdd   : > { %v696_v56 = vsel %vm2894_vm8, %v691_v47, %v695_v36  ;;  %v721_v62 = vshll.u32 %v3051_v50, 16  ;;  %v3073_v4 = vunpack.c.l.b16 %v682_v34  ;;  %v714_v7 = vrot.slane %v712_v57, 4  ;;  %1631 = vmatpush.bf16.msra.mxu0 %v2521_v3  ;;  %v2520_v36 = vld [vmem:[%s3414_s3 + $0x1d0] sm:$0xff] }
  0xde   : > { %v700_v42 = vrot.slane %v698_v39, 4  ;;  %v703_v52 = vrot.slane %v701_v40, 5  ;;  %v3075_v59 = vunpack.c.l.b16 %v696_v56  ;;  %v717_v9 = vrot.slane %v715_v61, 5  ;;  %1070 = vmatpush.bf16.msrb.mxu3 %v2479_v17  ;;  %v2478_v40 = vld [vmem:[%s3414_s3 + $0x80] sm:$0xff] }
  0xdf   : > { %v3079_v11 = vpack.c.b16 %v3054_v51, %v3054_v51  ;;  %v709_v14 = vrot.slane %v707_v54, 5  ;;  %v569_v15 = vsel %vm2861_vm4, 0, %v3003_v10  ;;  %v546_v18 = vshrl.u32 %v3056_v53, 16 }
  0xe0   : > { %v704_v6 = vor.u32 %v703_v52, %v700_v42  ;;  %v3083_v12 = vpack.c.b16 %v3075_v59, %v3073_v4  ;;  %v718_v19 = vor.u32 %v717_v9, %v714_v7  ;;  %v723_v20 = vrot.slane %v721_v62, 5  ;;  %v2517_v9 = vld [vmem:[%s3414_s3 + $0x1b8] sm:$0xff] }
  0xe1   : > { %v580_v21 = vsel %vm2870_vm5, %v569_v15, 0  ;;  %v3096_v22 = vpack.c.b16 %v3028_v30, %v3014_v16  ;;  %v619_v23 = vunpack.c.h.b16 %v3032_v32  ;;  %v726_v31 = vshrl.u32 %v3079_v11, 16  ;;  %v2502_v16 = vld [vmem:[%s3414_s3 + $0x140] sm:$0xff]  ;;  %1632 = vmatpush.bf16.msra.mxu0 %v2520_v36 }
  0xe2   : > { %v705_v13 = vrot.slane %v704_v6, 4  ;;  %v3101_v25 = vunpack.c.l.b16 %v580_v21  ;;  %v719_v27 = vrot.slane %v718_v19, 4  ;;  %v621_v29 = vunpack.c.h.b16 %v580_v21  ;;  %1426 = vmatpush.bf16.msra.mxu2 %v2502_v16  ;;  %1071 = vmatpush.bf16.msrb.mxu3 %v2478_v40 }
  0xe3   : > { %847 = vmatmul.bf16.gmra.mxu1 %v3083_v12  ;;  %v729_v34 = vshll.u32 %v3079_v11, 16  ;;  %v549_v43 = vshll.u32 %v3056_v53, 16  ;;  %v548_v47 = vrot.slane %v546_v18, 7  ;;  %v3132_v55 = vpack.c.b16 %v619_v23, %v619_v23 }
  0xe4   : > { %v710_v10 = vsel %vm2894_vm8, %v705_v13, %v709_v14  ;;  %v3117_v39 = vpack.c.b16 %v3101_v25, %v3101_v25  ;;  %v724_v44 = vsel %vm2894_vm8, %v719_v27, %v723_v20  ;;  %v3134_v56 = vpack.c.b16 %v621_v29, %v621_v29  ;;  %v2518_v13 = vld [vmem:[%s3414_s3 + $0x1c0] sm:$0xff] }
  0xe5   : > { %937 = vmatmul.bf16.gmra.mxu2 %v3096_v22  ;;  %v3113_v32 = vunpack.c.l.b16 %v710_v10  ;;  %v3128_v42 = vunpack.c.l.b16 %v724_v44  ;;  %v728_v53 = vrot.slane %v726_v31, 4  ;;  %v731_v57 = vrot.slane %v729_v34, 5  ;;  %1633 = vmatpush.bf16.msra.mxu0 %v2519_v45 }
  0xe6   : > { %v740_v52 = vshrl.u32 %v3117_v39, 16  ;;  %v743_v54 = vshll.u32 %v3117_v39, 16  ;;  %v1122_v62 = vpack.c.b16 %v3054_v51, %v3028_v30  ;;  %v749_v6 = vshll.u32 %v3134_v56, 16 }
  0xe7   : > { %v3138_v61 = vpack.c.b16 %v3128_v42, %v3113_v32  ;;  %v732_v14 = vor.u32 %v731_v57, %v728_v53  ;;  %v735_v30 = vshll.u32 %v3132_v55, 16  ;;  %v551_v15 = vor.u32 %v549_v43, %v548_v47 }
  0xe8   : > { %v742_v2 = vrot.slane %v740_v52, 4  ;;  %v745_v3 = vrot.slane %v743_v54, 5  ;;  %v751_v18 = vrot.slane %v749_v6, 5  ;;  %v1248_v10 = vpack.c.b16 %v3073_v4, %v2968_v46  ;;  %v2533_v46 = vld [vmem:[%s3414_s3 + $0x238] sm:$0xff]  ;;  %v2530_v54 = vld [vmem:[%s3414_s3 + $0x220] sm:$0xff] }
  0xe9   : > { %852 = vmatmul.bf16.vlgmr.msra.gmra.mxu3 %v3138_v61  ;;  %1634 = vmatpush.bf16.msra.mxu0 %v2518_v13  ;;  %v733_v19 = vrot.slane %v732_v14, 4  ;;  %v737_v20 = vrot.slane %v735_v30, 5  ;;  %v570_v21 = vsel %vm2861_vm4, 0, %v551_v15  ;;  %v3159_v27 = vpack.c.b16 %v3101_v25, %v3054_v51 }
  0xea   : > { %v746_v7 = vor.u32 %v745_v3, %v742_v2  ;;  %1523 = vmatpush.bf16.msra.mxu3 %v2517_v9  ;;  %v3165_v31 = vsel %vm2870_vm5, %v570_v21, 0  ;;  %1731 = vmatpush.bf16.msra.mxu1 %v2533_v46  ;;  %v961_v16 = vrot.slane %v2972_v48, 5  ;;  %v2103_v36 = vrot.slane %v2931_v5, 9  ;;  %v2515_v5 = vld [vmem:[%s3414_s3 + $0x1a8] sm:$0xff] }
  0xeb   : > { %v738_v29 = vsel %vm2894_vm8, %v733_v19, %v737_v20  ;;  %v3182_v34 = vunpack.c.l.b16 %v3165_v31  ;;  %v957_v44 = vrot.slane %v2899_v38, 5  ;;  %v2102_v45 = vrot.slane %v2889_v28, 9  ;;  %v2526_v19 = vld [vmem:[%s3414_s3 + $0x200] sm:$0xff] }
  0xec   : > { %1194 = vmatmul.bf16.gmra.mxu0 %v1122_v62  ;;  %v747_v17 = vrot.slane %v746_v7, 4  ;;  %v3179_v4 = vunpack.c.l.b16 %v738_v29  ;;  %v962_v38 = vsel %vm3195_vm11, %v2103_v36, %v961_v16  ;;  %v2101_v47 = vrot.slane %v2847_v41, 9  ;;  %v2514_v41 = vld [vmem:[%s3414_s3 + $0x1a0] sm:$0xff] }
  0xed   : > { %v1123_v43 = vpack.c.b16 %v3182_v34, %v3101_v25  ;;  %v2531_v25 = vld [vmem:[%s3414_s3 + $0x228] sm:$0xff]  ;;  %v958_v28 = vsel %vm3195_vm11, %v2102_v45, %v957_v44  ;;  %v953_v52 = vrot.slane %v2859_v0, 5  ;;  %v1002_v53 = vunpack.c.l.b16 %v962_v38  ;;  %v2529_v0 = vld [vmem:[%s3414_s3 + $0x218] sm:$0xff] }
  0xee   : > { %v752_v23 = vsel %vm2894_vm8, %v747_v17, %v751_v18  ;;  %1524 = vmatpush.bf16.msra.mxu3 %v2516_v1  ;;  %1732 = vmatpush.bf16.msra.mxu1 %v2532_v8  ;;  %v1001_v57 = vunpack.c.l.b16 %v958_v28  ;;  %v1249_v62 = vpack.c.b16 %v3113_v32, %v3075_v59  ;;  %v2528_v59 = vld [vmem:[%s3414_s3 + $0x210] sm:$0xff]  ;;  %v3232_v32 = vpack.c.b16 %v3182_v34, %v3182_v34 }
  0xef   : > { %v3174_v51 = vunpack.c.l.b16 %v752_v23  ;;  %v3218_v2 = vsel %vm3195_vm11, %v2101_v47, %v953_v52  ;;  %v2105_v7 = vrot.slane %v3023_v35, 9  ;;  %v969_v9 = vrot.slane %v3025_v24, 5  ;;  %v2513_v35 = vld [vmem:[%s3414_s3 + $0x198] sm:$0xff]  ;;  %v2512_v24 = vld [vmem:[%s3414_s3 + $0x190] sm:$0xff] }
  0xf0   : > { %v1363_v3 = vpack.c.b16 %v1002_v53, %v1001_v57  ;;  %v1000_v6 = vunpack.c.l.b16 %v3218_v2  ;;  %v2104_v14 = vrot.slane %v2980_v58, 9  ;;  %v965_v30 = vrot.slane %v2985_v63, 5  ;;  %v2527_v58 = vld [vmem:[%s3414_s3 + $0x208] sm:$0xff] }
  0xf1   : > { %v3188_v40 = vpack.c.b16 %v3174_v51, %v3179_v4  ;;  %v1213_v15 = vunpack.c.h.b16 %v3165_v31  ;;  %v1217_v17 = vshrl.u32 %v3232_v32, 16  ;;  %v1220_v18 = vshll.u32 %v3232_v32, 16 }
  0xf2   : > { %1525 = vmatpush.bf16.msra.mxu3 %v2515_v5  ;;  %1733 = vmatpush.bf16.msra.mxu1 %v2531_v25  ;;  %v1008_v13 = vpack.c.b16 %v1001_v57, %v1000_v6  ;;  %v970_v63 = vsel %vm3195_vm11, %v2105_v7, %v969_v9  ;;  %v1250_v31 = vpack.c.b16 %v3179_v4, %v3128_v42  ;;  %v973_v44 = vrot.slane %v3051_v50, 5  ;;  %v2511_v4 = vld [vmem:[%s3414_s3 + $0x188] sm:$0xff] }
  0xf3   : > { %1312 = vmatmul.bf16.vlgmr.msrb.gmra.mxu1 %v1248_v10  ;;  %v1215_v20 = vpack.c.b16 %v1213_v15, %v1213_v15  ;;  %v1004_v21 = vunpack.c.l.b16 %v970_v63  ;;  %v1219_v10 = vrot.slane %v1217_v17, 4  ;;  %v1222_v23 = vrot.slane %v1220_v18, 5 }
  0xf4   : > { %v2107_v45 = vrot.slane %v3079_v11, 9  ;;  %v977_v5 = vrot.slane %v3132_v55, 5  ;;  %v2510_v11 = vld [vmem:[%s3414_s3 + $0x180] sm:$0xff]  ;;  %v2253_v47 = vrot.slane %v3232_v32, 9  ;;  %v981_v57 = vrot.slane %v3134_v56, 5 }
  0xf5   : > { %942 = vmatmul.bf16.gmra.mxu2 %v3159_v27  ;;  %v1223_v46 = vor.u32 %v1222_v23, %v1219_v10  ;;  %v1226_v8 = vshll.u32 %v1215_v20, 16  ;;  %v1343_v52 = vrot.slane %v1215_v20, 5 }
  0xf6   : > { %1734 = vmatpush.bf16.msra.mxu1 %v2530_v54  ;;  %1526 = vmatpush.bf16.msra.mxu3 %v2514_v41  ;;  %v978_v50 = vsel %vm3195_vm11, %v2107_v45, %v977_v5 }
  0xf7   : > { %v1224_v16 = vrot.slane %v1223_v46, 4  ;;  %v1228_v36 = vrot.slane %v1226_v8, 5  ;;  %v1006_v38 = vunpack.c.l.b16 %v978_v50 }
  0xf9   : > { %857 = vmatmul.bf16.gmra.mxu3 %v3188_v40  ;;  %v1229_v42 = vsel %vm2894_vm8, %v1224_v16, %v1228_v36 }
  0xfa   : > { %1735 = vmatpush.bf16.msra.mxu1 %v2529_v0  ;;  %1527 = vmatpush.bf16.msra.mxu3 %v2513_v35  ;;  %v1247_v55 = vunpack.c.l.b16 %v1229_v42 }
  0xfc   : > { %1199 = vmatmul.bf16.gmra.mxu0 %v1123_v43  ;;  %v2106_v43 = vrot.slane %v3049_v49, 9  ;;  %v1251_v33 = vpack.c.b16 %v1247_v55, %v3174_v51  ;;  %v1577_v32 = vpack.c.b16 %v2952_v26, %v1247_v55 }
  0xfe   : > { %1736 = vmatpush.bf16.msra.mxu1 %v2528_v59  ;;  %1528 = vmatpush.bf16.msra.mxu3 %v2512_v24  ;;  %v974_v49 = vsel %vm3195_vm11, %v2106_v43, %v973_v44 }
 0x102   : > { %1737 = vmatpush.bf16.msra.mxu1 %v2527_v58  ;;  %1529 = vmatpush.bf16.msra.mxu3 %v2511_v4 }
 0x103   : > { %1317 = vmatmul.bf16.gmra.mxu1 %v1249_v62  ;;  %v1344_v62 = vsel %vm3195_vm11, %v2253_v47, %v1343_v52 }
 0x105   : > { %1427 = vmatmul.bf16.vlgmr.msra.gmra.mxu2 %v1363_v3  ;;  %v1362_v3 = vunpack.c.l.b16 %v1344_v62 }
 0x106   : > { %1738 = vmatpush.bf16.msra.mxu1 %v2526_v19  ;;  %1530 = vmatpush.bf16.msra.mxu3 %v2510_v11 }
 0x107   : > { %v1681_v48 = vpack.c.b16 %v1000_v6, %v1362_v3 }
 0x109   : > { %1072 = vmatmul.bf16.vlgmr.msrb.gmra.mxu3 %v1008_v13 }
 0x10c   : > { %1635 = vmatmul.bf16.vlgmr.msra.gmra.mxu0 %v3083_v12  ;;  %v966_v12 = vsel %vm3195_vm11, %v2104_v14, %v965_v30 }
 0x10d   : > { %v1003_v29 = vunpack.c.l.b16 %v966_v12 }
 0x10f   : > { %v1364_v1 = vpack.c.b16 %v1004_v21, %v1003_v29  ;;  %v1009_v25 = vpack.c.b16 %v1003_v29, %v1002_v53  ;;  %v2108_v53 = vrot.slane %v3117_v39, 9 }
 0x111   : > { %v982_v51 = vsel %vm3195_vm11, %v2108_v53, %v981_v57 }
 0x112   : > { %v1007_v41 = vunpack.c.l.b16 %v982_v51 }
 0x113   : > { %1322 = vmatmul.bf16.gmra.mxu1 %v1250_v31 }
 0x114   : > { %v1366_v0 = vpack.c.b16 %v1362_v3, %v1007_v41  ;;  %v1011_v59 = vpack.c.b16 %v1007_v41, %v1006_v38 }
 0x115   : > { %1432 = vmatmul.bf16.gmra.mxu2 %v1364_v1 }
 0x119   : > { %1077 = vmatmul.bf16.gmra.mxu3 %v1009_v25 }
 0x11c   : > { %1640 = vmatmul.bf16.gmra.mxu0 %v3138_v61  ;;  %v1005_v61 = vunpack.c.l.b16 %v974_v49 }
 0x11e   : > { %v1365_v28 = vpack.c.b16 %v1006_v38, %v1005_v61  ;;  %v1010_v54 = vpack.c.b16 %v1005_v61, %v1004_v21 }
 0x123   : > { %1327 = vmatmul.bf16.gmra.mxu1 %v1251_v33 }
 0x125   : > { %1437 = vmatmul.bf16.gmra.mxu2 %v1365_v28 }
 0x129   : > { %1082 = vmatmul.bf16.gmra.mxu3 %v1010_v54 }
 0x12c   : > { %1645 = vmatmul.bf16.gmra.mxu0 %v3188_v40 }
 0x133   : > { %1739 = vmatmul.bf16.vlgmr.msra.gmra.mxu1 %v1009_v25 }
 0x135   : > { %1442 = vmatmul.bf16.gmra.mxu2 %v1366_v0  ;;  %v3337_v0 = vld [vmem:[#allocation4] ss:$0 sm:$0xff] }
 0x139   : > { %1087 = vmatmul.bf16.gmra.mxu3 %v1011_v59 }
 0x13c   : > { %1650 = vmatmul.bf16.gmra.mxu0 %v1577_v32 }
 0x143   : > { %1744 = vmatmul.bf16.gmra.mxu1 %v1010_v54 }
 0x147   : > { %v928_v26 = vpop.f32.mrf.mxu2 }
 0x149   : > { %1531 = vmatmul.bf16.vlgmr.msra.gmra.mxu3 %v2983_v60  ;;  %v1185_v13 = vpop.f32.mrf.mxu0 }
 0x14f   : > { %v930_v30 = vpop.f32.mrf.mxu2 }
 0x150   : > { %v843_v39 = vpop.f32.mrf.mxu1 }
 0x151   : > { %v1187_v15 = vpop.f32.mrf.mxu0  ;;  %v929_v42 = vadd.f32 %v928_v26, %v843_v39 }
 0x153   : > { %1749 = vmatmul.bf16.gmra.mxu1 %v1011_v59 }
 0x158   : > { %v845_v56 = vpop.f32.mrf.mxu1  ;;  %v933_v17 = vpop.f32.mrf.mxu2 }
 0x159   : > { %1536 = vmatmul.bf16.gmra.mxu3 %v3096_v22  ;;  %v1473_v22 = vpack.c.b16 %v2839_v37, %v3182_v34  ;;  %v1190_v18 = vpop.f32.mrf.mxu0  ;;  %v931_v61 = vadd.f32 %v930_v30, %v845_v56 }
 0x160   : > { %v848_v40 = vpop.f32.mrf.mxu1  ;;  %v935_v58 = vpop.f32.mrf.mxu2 }
 0x161   : > { %v1192_v24 = vpop.f32.mrf.mxu0  ;;  %v934_v62 = vadd.f32 %v933_v17, %v848_v40 }
 0x163   : > { %1754 = vmatmul.bf16.gmra.mxu1 %v1681_v48 }
 0x168   : > { %v3293_v7 = vpop.f32.mrf.mxu1  ;;  %v938_v19 = vpop.f32.mrf.mxu2 }
 0x169   : > { %1541 = vmatmul.bf16.gmra.mxu3 %v3159_v27  ;;  %v3308_v21 = vpop.f32.mrf.mxu0 }
 0x16c   : > { %v3296_v9 = vpop.f32.mrf.mxu3 }
 0x170   : > { %v1313_v14 = vpop.f32.mrf.mxu1  ;;  %v3312_v10 = vpop.f32.mrf.mxu2 }
 0x171   : > { %v3314_v23 = vpop.f32.mrf.mxu0 }
 0x174   : > { %v3298_v60 = vpop.f32.mrf.mxu3 }
 0x178   : > { %v1315_v2 = vpop.f32.mrf.mxu1  ;;  %v3318_v1 = vpop.f32.mrf.mxu2 }
 0x179   : > { %1546 = vmatmul.bf16.gmra.mxu3 %v1473_v22  ;;  %v3320_v46 = vpop.f32.mrf.mxu0 }
 0x17c   : > { %v3302_v6 = vpop.f32.mrf.mxu3 }
 0x180   : > { %v1318_v27 = vpop.f32.mrf.mxu1  ;;  %v3324_v36 = vpop.f32.mrf.mxu2 }
 0x181   : > { %v3328_v44 = vpop.f32.mrf.mxu0 }
 0x184   : > { %v3304_v35 = vpop.f32.mrf.mxu3 }
 0x188   : > { %v3306_v12 = vpop.f32.mrf.mxu1  ;;  %v1428_v5 = vpop.f32.mrf.mxu2 }
 0x189   : > { %v1636_v49 = vpop.f32.mrf.mxu0 }
 0x18c   : > { %v1073_v63 = vpop.f32.mrf.mxu3 }
 0x18d   : > { %v1093_v4 = vadd.f32 %v1073_v63, %v929_v42 }
 0x18f   : > { %v1205_v11 = vadd.f32 %v1185_v13, %v1093_v4  ;;  %v939_v4 = vadd.f32 %v938_v19, %v3296_v9 }
 0x190   : > { %v3310_v37 = vpop.f32.mrf.mxu1  ;;  %v1430_v38 = vpop.f32.mrf.mxu2 }
 0x191   : > { %v1333_v28 = vadd.f32 %v1313_v14, %v1205_v11  ;;  %v1638_v47 = vpop.f32.mrf.mxu0  ;;  %v936_v14 = vadd.f32 %v935_v58, %v3293_v7 }
 0x193   : > { %v1448_v54 = vadd.f32 %v1428_v5, %v1333_v28 }
 0x194   : > { %v1075_v20 = vpop.f32.mrf.mxu3 }
 0x195   : > { %v1094_v33 = vadd.f32 %v1075_v20, %v931_v61 }
 0x197   : > { %v1206_v52 = vadd.f32 %v1187_v15, %v1094_v33 }
 0x198   : > { %v3316_v29 = vpop.f32.mrf.mxu1  ;;  %v1433_v32 = vpop.f32.mrf.mxu2 }
 0x199   : > { %v1334_v59 = vadd.f32 %v1315_v2, %v1206_v52  ;;  %v1641_v26 = vpop.f32.mrf.mxu0 }
 0x19b   : > { %v1449_v40 = vadd.f32 %v1430_v38, %v1334_v59 }
 0x19c   : > { %v1078_v34 = vpop.f32.mrf.mxu3 }
 0x19d   : > { %v1095_v3 = vadd.f32 %v1078_v34, %v934_v62 }
 0x19f   : > { %v1207_v56 = vadd.f32 %v1190_v18, %v1095_v3 }
 0x1a0   : > { %v3322_v16 = vpop.f32.mrf.mxu1  ;;  %v1435_v20 = vpop.f32.mrf.mxu2 }
 0x1a1   : > { %v1335_v17 = vadd.f32 %v1318_v27, %v1207_v56  ;;  %v1643_v58 = vpop.f32.mrf.mxu0 }
 0x1a3   : > { %v1450_v5 = vadd.f32 %v1433_v32, %v1335_v17 }
 0x1a4   : > { %v1080_v31 = vpop.f32.mrf.mxu3 }
 0x1a5   : > { %v1096_v15 = vadd.f32 %v1080_v31, %v936_v14  ;;  %v946_v14 = vadd.f32 %v3324_v36, %v3304_v35 }
 0x1a7   : > { %v1208_v34 = vadd.f32 %v1192_v24, %v1096_v15 }
 0x1a8   : > { %v3330_v45 = vpop.f32.mrf.mxu1  ;;  %v1438_v19 = vpop.f32.mrf.mxu2 }
 0x1a9   : > { %v1336_v31 = vadd.f32 %v3306_v12, %v1208_v34 }
 0x1ab   : > { %v1451_v9 = vadd.f32 %v1435_v20, %v1336_v31 }
 0x1ac   : > { %v1083_v8 = vpop.f32.mrf.mxu3 }
 0x1b0   : > { %v1740_v50 = vpop.f32.mrf.mxu1 }
 0x1b4   : > { %v3326_v43 = vpop.f32.mrf.mxu3 }
 0x1b8   : > { %v1742_v53 = vpop.f32.mrf.mxu1 }
 0x1bc   : > { %v3332_v25 = vpop.f32.mrf.mxu3 }
 0x1c0   : > { %v1745_v22 = vpop.f32.mrf.mxu1 }
 0x1c4   : > { %v3334_v55 = vpop.f32.mrf.mxu3 }
 0x1c8   : > { %v1747_v27 = vpop.f32.mrf.mxu1 }
 0x1cc   : > { %v1532_v57 = vpop.f32.mrf.mxu3 }
 0x1cd   : > { %v1552_v51 = vadd.f32 %v1532_v57, %v1448_v54  ;;  %v1646_v54 = vpop.f32.mrf.mxu0 }
 0x1cf   : > { %v1656_v41 = vadd.f32 %v1636_v49, %v1552_v51  ;;  %v1097_v49 = vadd.f32 %v1083_v8, %v939_v4  ;;  %v941_v8 = vadd.f32 %v3312_v10, %v3298_v60  ;;  %v944_v10 = vadd.f32 %v3318_v1, %v3302_v6 }
 0x1d0   : > { %v1750_v57 = vpop.f32.mrf.mxu1 }
 0x1d1   : > { %v1760_v39 = vadd.f32 %v1740_v50, %v1656_v41  ;;  %v1209_v24 = vadd.f32 %v3308_v21, %v1097_v49  ;;  %v1098_v21 = vadd.f32 %v3326_v43, %v941_v8  ;;  %v1099_v59 = vadd.f32 %v3332_v25, %v944_v10 }
 0x1d2   : > { %v1100_v25 = vadd.f32 %v3334_v55, %v946_v14 }
 0x1d3   : > { %v3345_v48 = vadd.f32 %v3337_v0, %v1760_v39  ;;  %v1337_v52 = vadd.f32 %v3310_v37, %v1209_v24  ;;  %v1210_v62 = vadd.f32 %v3314_v23, %v1098_v21  ;;  %v1440_v37 = vpop.f32.mrf.mxu2 }
 0x1d4   : > { %v1534_v13 = vpop.f32.mrf.mxu3 }
 0x1d5   : > { %1780 = vst [vmem:[%s3342_s13] sm:$0xff] %v3345_v48  ;;  %v1553_v30 = vadd.f32 %v1534_v13, %v1449_v40  ;;  %v1452_v3 = vadd.f32 %v1438_v19, %v1337_v52  ;;  %v1338_v23 = vadd.f32 %v3316_v29, %v1210_v62  ;;  %v1648_v56 = vpop.f32.mrf.mxu0  ;;  %v1211_v40 = vadd.f32 %v3320_v46, %v1099_v59 }
 0x1d6   : > { %v1212_v46 = vadd.f32 %v3328_v44, %v1100_v25 }
 0x1d7   : > { %v1657_v2 = vadd.f32 %v1638_v47, %v1553_v30  ;;  %v1453_v13 = vadd.f32 %v1440_v37, %v1338_v23  ;;  %v1339_v29 = vadd.f32 %v3322_v16, %v1211_v40 }
 0x1d8   : > { %v1752_v6 = vpop.f32.mrf.mxu1  ;;  %v1340_v55 = vadd.f32 %v3330_v45, %v1212_v46 }
 0x1d9   : > { %v1761_v63 = vadd.f32 %v1742_v53, %v1657_v2 }
 0x1db   : > { %v3351_v18 = vadd.f32 %v3337_v0, %v1761_v63  ;;  %v1443_v2 = vpop.f32.mrf.mxu2 }
 0x1dc   : > { %v1537_v42 = vpop.f32.mrf.mxu3  ;;  %v1454_v20 = vadd.f32 %v1443_v2, %v1339_v29 }
 0x1dd   : > { %1781 = vst [vmem:[%s3342_s13 + $0x8] sm:$0xff] %v3351_v18  ;;  %v1554_v7 = vadd.f32 %v1537_v42, %v1450_v5  ;;  %v1788_v61 = vadd.f32 %v3351_v18, %v3345_v48  ;;  %v1651_v34 = vpop.f32.mrf.mxu0 }
 0x1df   : > { %v1658_v50 = vadd.f32 %v1641_v26, %v1554_v7 }
 0x1e0   : > { %v1755_v42 = vpop.f32.mrf.mxu1 }
 0x1e1   : > { %v1762_v11 = vadd.f32 %v1745_v22, %v1658_v50 }
 0x1e3   : > { %v3361_v38 = vadd.f32 %v3337_v0, %v1762_v11  ;;  %v1445_v16 = vpop.f32.mrf.mxu2 }
 0x1e4   : > { %v1539_v33 = vpop.f32.mrf.mxu3  ;;  %v1455_v49 = vadd.f32 %v1445_v16, %v1340_v55 }
 0x1e5   : > { %1782 = vst [vmem:[%s3342_s13 + $0x10] sm:$0xff] %v3361_v38  ;;  %v1789_v12 = vadd.f32 %v1788_v61, %v3361_v38  ;;  %v1555_v28 = vadd.f32 %v1539_v33, %v1451_v9 }
 0x1e7   : > { %v1659_v47 = vadd.f32 %v1643_v58, %v1555_v28 }
 0x1e8   : > { %v1757_v24 = vpop.f32.mrf.mxu1 }
 0x1e9   : > { %v1763_v53 = vadd.f32 %v1747_v27, %v1659_v47  ;;  %v1653_v27 = vpop.f32.mrf.mxu0 }
 0x1eb   : > { %v3372_v51 = vadd.f32 %v3337_v0, %v1763_v53 }
 0x1ec   : > { %v1542_v60 = vpop.f32.mrf.mxu3 }
 0x1ed   : > { %1783 = vst [vmem:[%s3342_s13 + $0x18] sm:$0xff] %v3372_v51  ;;  %v1790_v43 = vadd.f32 %v1789_v12, %v3372_v51  ;;  %v1556_v41 = vadd.f32 %v1542_v60, %v1452_v3 }
 0x1ef   : > { %v1660_v32 = vadd.f32 %v1646_v54, %v1556_v41 }
 0x1f1   : > { %v1764_v39 = vadd.f32 %v1750_v57, %v1660_v32 }
 0x1f3   : > { %v1776_v26 = vadd.f32 %v3337_v0, %v1764_v39 }
 0x1f4   : > { %v1544_v1 = vpop.f32.mrf.mxu3 }
 0x1f5   : > { %1784 = vst [vmem:[%s3342_s13 + $0x20] sm:$0xff] %v1776_v26  ;;  %v1791_v30 = vadd.f32 %v1790_v43, %v1776_v26  ;;  %v1557_v22 = vadd.f32 %v1544_v1, %v1453_v13 }
 0x1f7   : > { %v1661_v15 = vadd.f32 %v1648_v56, %v1557_v22 }
 0x1f9   : > { %v1765_v17 = vadd.f32 %v1752_v6, %v1661_v15 }
 0x1fb   : > { %v1777_v63 = vadd.f32 %v3337_v0, %v1765_v17 }
 0x1fc   : > { %v1547_v5 = vpop.f32.mrf.mxu3 }
 0x1fd   : > { %1785 = vst [vmem:[%s3342_s13 + $0x28] sm:$0xff] %v1777_v63  ;;  %v1792_v35 = vadd.f32 %v1791_v30, %v1777_v63  ;;  %v1558_v36 = vadd.f32 %v1547_v5, %v1454_v20 }
 0x1ff   : > { %v1662_v4 = vadd.f32 %v1651_v34, %v1558_v36 }
 0x201   : > { %v1766_v7 = vadd.f32 %v1755_v42, %v1662_v4 }
 0x203   : > { %v1778_v58 = vadd.f32 %v3337_v0, %v1766_v7 }
 0x204   : > { %v1549_v44 = vpop.f32.mrf.mxu3 }
 0x205   : > { %1786 = vst [vmem:[%s3342_s13 + $0x30] sm:$0xff] %v1778_v58  ;;  %v1793_v50 = vadd.f32 %v1792_v35, %v1778_v58  ;;  %v1559_v31 = vadd.f32 %v1549_v44, %v1455_v49 }
 0x207   : > { %v1663_v11 = vadd.f32 %v1653_v27, %v1559_v31 }
 0x209   : > { %v1767_v61 = vadd.f32 %v1757_v24, %v1663_v11 }
 0x20b   : > { %v1779_v9 = vadd.f32 %v3337_v0, %v1767_v61 }
 0x20d   : > { %1787 = vst [vmem:[%s3342_s13 + $0x38] sm:$0xff] %v1779_v9  ;;  %v1794_v19 = vadd.f32 %v1793_v50, %v1779_v9 }
 0x20f   : > { %v1795_v33 = vrot.slane %v1794_v19, 4 }
 0x211   : > { %v1796_v45 = vadd.f32 %v1795_v33, %v1794_v19 }
 0x213   : > { %v1797_v8 = vrot.slane %v1796_v45, 2 }
 0x215   : > { %v1798_v12 = vadd.f32 %v1797_v8, %v1796_v45 }
 0x217   : > { %v1799_v28 = vrot.slane %v1798_v12, 1 }
 0x219   : > { %v1800_v21 = vadd.f32 %v1799_v28, %v1798_v12 }
 0x21b   : > { %v1801_v47 = vmul.f32 0.015625, %v1800_v21  ;;  %1810 = vst [vmem:[%s322_s16] sm:$0x1] %v1800_v21 }
 0x21d   : > { %v1802_v52 = vsub.f32 %v3345_v48, %v1801_v47  ;;  %v1803_v54 = vsub.f32 %v3351_v18, %v1801_v47  ;;  %v1804_v0 = vsub.f32 %v3361_v38, %v1801_v47  ;;  %v1805_v53 = vsub.f32 %v3372_v51, %v1801_v47 }
 0x21e   : > { %v1806_v57 = vsub.f32 %v1776_v26, %v1801_v47  ;;  %v1807_v62 = vsub.f32 %v1777_v63, %v1801_v47  ;;  %v1808_v3 = vsub.f32 %v1778_v58, %v1801_v47  ;;  %v1809_v60 = vsub.f32 %v1779_v9, %v1801_v47 }
 0x21f   : > { %v1811_v10 = vmul.f32 %v1802_v52, %v1802_v52  ;;  %v1812_v43 = vmul.f32 %v1803_v54, %v1803_v54  ;;  %v1813_v41 = vmul.f32 %v1804_v0, %v1804_v0  ;;  %v1814_v59 = vmul.f32 %v1805_v53, %v1805_v53 }
 0x220   : > { %v1815_v23 = vmul.f32 %v1806_v57, %v1806_v57  ;;  %v1816_v48 = vmul.f32 %v1807_v62, %v1807_v62  ;;  %v1817_v18 = vmul.f32 %v1808_v3, %v1808_v3  ;;  %v1818_v38 = vmul.f32 %v1809_v60, %v1809_v60 }
 0x221   : > { %v1819_v37 = vadd.f32 %v1812_v43, %v1811_v10 }
 0x223   : > { %v1820_v32 = vadd.f32 %v1819_v37, %v1813_v41 }
 0x225   : > { %v1821_v39 = vadd.f32 %v1820_v32, %v1814_v59 }
 0x227   : > { %v1822_v56 = vadd.f32 %v1821_v39, %v1815_v23 }
 0x229   : > { %v1823_v40 = vadd.f32 %v1822_v56, %v1816_v48 }
 0x22b   : > { %v1824_v13 = vadd.f32 %v1823_v40, %v1817_v18 }
 0x22d   : > { %v1825_v51 = vadd.f32 %v1824_v13, %v1818_v38 }
 0x22f   : > { %v1826_v26 = vrot.slane %v1825_v51, 4 }
 0x231   : > { %v1827_v6 = vadd.f32 %v1826_v26, %v1825_v51 }
 0x233   : > { %v1828_v1 = vrot.slane %v1827_v6, 2 }
 0x235   : > { %v1829_v14 = vadd.f32 %v1828_v1, %v1827_v6 }
 0x237   : > { %v1830_v30 = vrot.slane %v1829_v14, 1 }
 0x239   : > { %v1831_v22 = vadd.f32 %v1830_v30, %v1829_v14 }
 0x23b   : > { %1832 = vst [vmem:[%s325_s19] sm:$0x1] %v1831_v22 }
 0x23c PF: > { %s20_s24 = sadd.s32 1, %s2656_s24  }
 0x23d   : > { %p17_p7 = scmp.ge.s32.totalorder %s20_s24, 4  }
 0x23f   :  { %19 = sbr.rel (!%p17_p7) target bundleno = 2 (0x2), region = 111 }
 0x244   :  { %1878 = vsyncpa [#allocation3], 1 }
 0x245   :  { %1880 = vsyncpa [#allocation3 + $0x1], 1 }
 0x246   :  { %1881 = vsyncpa [#allocation5], 1 }

</bundles_post_ra>
